<compile_context>
chip_gen: v7x
topology: tpu7x:2x2x1
jax: 0.10.0
libtpu: 0.0.40
codegen_flags: <defaults>
</compile_context>

<pallas_src>
import functools
import math

import jax
import jax.numpy as jnp
from jax.experimental import pallas as pl
from jax.experimental.pallas import tpu as pltpu


class Results_Obj:
    def __init__(self):
        self.last_hidden_state = None

    def set_results(self, results):
        self.last_hidden_state = results


# ------------------------------------------------------------------ kernel --
def _mhatt_kernel(x_ref, w_enc_ref, b_enc_ref,
                  wq_ref, bq_ref, wk_ref, bk_ref, wv_ref, bv_ref,
                  wo_ref, b_out_ref, o_ref, *, num_heads, mm_dtype):
    """One batch element per grid step: encoder Linear + 4-head self-attention."""
    head_dim = wq_ref.shape[-1]
    d_model = wo_ref.shape[-1]
    scale = 1.0 / math.sqrt(head_dim)

    def mm(a, b):
        return jnp.dot(a.astype(mm_dtype), b.astype(mm_dtype),
                       preferred_element_type=jnp.float32)

    x = x_ref[0]                                                # (S, D) f32
    seq = x.shape[0]

    # self.enccoder : Linear(d_model, d_model)
    h = mm(x, w_enc_ref[...]) + b_enc_ref[...]                  # (S, D)

    # Multi-head attention; out-projection fused as per-head accumulation.
    acc = jnp.zeros((seq, d_model), jnp.float32)                # (S, D)
    for hh in range(num_heads):                                 # static 4-way unroll
        q = (mm(h, wq_ref[hh]) + bq_ref[hh]) * scale            # (S, hd)
        k = mm(h, wk_ref[hh]) + bk_ref[hh]                      # (S, hd)
        v = mm(h, wv_ref[hh]) + bv_ref[hh]                      # (S, hd)

        # scores = q @ k^T (contract head dim of both operands, no transpose op)
        s = jax.lax.dot_general(
            q.astype(mm_dtype), k.astype(mm_dtype),
            dimension_numbers=(((1,), (1,)), ((), ())),
            preferred_element_type=jnp.float32)                 # (S, S)
        s = s - jnp.max(s, axis=-1, keepdims=True)
        p = jnp.exp(s)
        denom = jnp.sum(p, axis=-1, keepdims=True)
        p = p * pl.reciprocal(denom, approx=True)               # EUP, not VALU

        ctx = mm(p, v)                                          # (S, hd)
        acc = acc + mm(ctx, wo_ref[hh])                         # fused out-proj

    o_ref[0] = (acc + b_out_ref[...]).astype(o_ref.dtype)


# ----------------------------------------------------------------- wrapper --
def mhatt_backbone_forward(x, packed, *, num_heads=4, mm_dtype=jnp.float32):
    """x: (B, S, d_model) f32 -> Results_Obj with last_hidden_state (B, S, d_model)."""
    B, S, D = x.shape
    hd = D // num_heads
    kernel = functools.partial(_mhatt_kernel, num_heads=num_heads,
                               mm_dtype=mm_dtype)
    const2 = lambda b: (0, 0)       # weights: DMA'd once, VMEM-resident
    const3 = lambda b: (0, 0, 0)

    last_hidden = pl.pallas_call(
        kernel,
        out_shape=jax.ShapeDtypeStruct((B, S, D), jnp.float32),
        grid_spec=pltpu.PrefetchScalarGridSpec(
            num_scalar_prefetch=0,
            grid=(B,),
            in_specs=[
                pl.BlockSpec((1, S, D), lambda b: (b, 0, 0)),       # x: one batch / step
                pl.BlockSpec((D, D), const2),                       # w_enc
                pl.BlockSpec((1, D), const2),                       # b_enc
                pl.BlockSpec((num_heads, D, hd), const3),           # wq (H, D, hd)
                pl.BlockSpec((num_heads, 1, hd), const3),           # bq
                pl.BlockSpec((num_heads, D, hd), const3),           # wk
                pl.BlockSpec((num_heads, 1, hd), const3),           # bk
                pl.BlockSpec((num_heads, D, hd), const3),           # wv
                pl.BlockSpec((num_heads, 1, hd), const3),           # bv
                pl.BlockSpec((num_heads, hd, D), const3),           # wo (H, hd, D)
                pl.BlockSpec((1, D), const2),                       # b_out
            ],
            out_specs=pl.BlockSpec((1, S, D), lambda b: (b, 0, 0)),
        ),
        compiler_params=pltpu.CompilerParams(
            dimension_semantics=("parallel",),      # megacore-shard over batch
            vmem_limit_bytes=32 * 1024 * 1024,      # plenty; fits v7x's 64 MiB
        ),
    )(x, packed["w_enc"], packed["b_enc"],
      packed["wq"], packed["bq"], packed["wk"], packed["bk"],
      packed["wv"], packed["bv"], packed["wo"], packed["b_out"])

    res = Results_Obj()
    res.set_results(last_hidden)
    return res


# -------------------------------------------------------------------- init --
def init_params(key, d_model):
    """PyTorch-layout-equivalent params (stored transposed so y = x @ W + b)."""
    ks = jax.random.split(key, 4)
    bound = 1.0 / math.sqrt(d_model)
    return {
        "w_enc": jax.random.uniform(ks[0], (d_model, d_model), jnp.float32,
                                    -bound, bound),
        "b_enc": jax.random.uniform(ks[1], (d_model,), jnp.float32, -bound, bound),
        # in_proj_weight^T : (D, 3D) = [Wq | Wk | Wv]; bias zero like torch default
        "w_in": jax.random.normal(ks[2], (d_model, 3 * d_model), jnp.float32)
                * math.sqrt(2.0 / (4.0 * d_model)),
        "b_in": jnp.zeros((3 * d_model,), jnp.float32),
        "w_out": jax.random.uniform(ks[3], (d_model, d_model), jnp.float32,
                                    -bound, bound),
        "b_out": jnp.zeros((d_model,), jnp.float32),
    }


def pack_params(params, num_heads):
    """One-time per-head repacking (layout plumbing, done once outside the kernel)."""
    D = params["w_enc"].shape[0]
    hd = D // num_heads
    w_in, b_in = params["w_in"], params["b_in"]

    def split_w(w):                       # (D, D) -> (H, D, hd)
        return jnp.transpose(w.reshape(D, num_heads, hd), (1, 0, 2))

    def split_b(b):                       # (D,) -> (H, 1, hd)
        return b.reshape(num_heads, 1, hd)

    return {
        "w_enc": params["w_enc"],
        "b_enc": params["b_enc"].reshape(1, D),
        "wq": split_w(w_in[:, :D]),
        "bq": split_b(b_in[:D]),
        "wk": split_w(w_in[:, D:2 * D]),
        "bk": split_b(b_in[D:2 * D]),
        "wv": split_w(w_in[:, 2 * D:]),
        "bv": split_b(b_in[2 * D:]),
        "wo": params["w_out"].reshape(num_heads, hd, D),   # (H, hd, D)
        "b_out": params["b_out"].reshape(1, D),
    }


# --------------------------------------------------------------- reference --
def reference_forward(x, params, num_heads):
    hp = jax.lax.Precision.HIGHEST
    B, S, D = x.shape
    hd = D // num_heads
    h = jnp.dot(x, params["w_enc"], precision=hp) + params["b_enc"]
    qkv = jnp.dot(h, params["w_in"], precision=hp) + params["b_in"]
    q, k, v = qkv[..., :D], qkv[..., D:2 * D], qkv[..., 2 * D:]

    def heads(t):                          # (B, S, D) -> (B, H, S, hd)
        return jnp.transpose(t.reshape(B, S, num_heads, hd), (0, 2, 1, 3))

    q, k, v = heads(q) / math.sqrt(hd), heads(k), heads(v)
    s = jnp.einsum("bhqd,bhkd->bhqk", q, k, precision=hp)
    p = jax.nn.softmax(s, axis=-1)
    ctx = jnp.einsum("bhqk,bhkd->bhqd", p, v, precision=hp)
    ctx = jnp.transpose(ctx, (0, 2, 1, 3)).reshape(B, S, D)
    return jnp.dot(ctx, params["w_out"], precision=hp) + params["b_out"]


# -------------------------------------------------------------------- main --
if __name__ == "__main__":
    B, S, D, H = 2, 8, 128, 4       # batch, seq, d_model, num_heads
    key = jax.random.PRNGKey(0)
    kx, kp = jax.random.split(key)
    x = jax.random.normal(kx, (B, S, D), jnp.float32)
    params = init_params(kp, D)
    packed = pack_params(params, H)

    res = mhatt_backbone_forward(x, packed, num_heads=H)
    out = jax.block_until_ready(res.last_hidden_state)
    assert out.shape == (B, S, D), out.shape
    assert bool(jnp.all(jnp.isfinite(out)))

    ref = reference_forward(x, params, H)
    assert bool(jnp.allclose(out, ref, rtol=2e-2, atol=2e-2)), \
        float(jnp.max(jnp.abs(out - ref)))
    print("KERNEL_OK")
</pallas_src>

<mosaic_0001>
module attributes {stable_mosaic.version = 11 : i64} {
  func.func @_mhatt_kernel(%arg0: i32, %arg1: memref<1x8x128xf32, #tpu.memory_space<vmem>>, %arg2: memref<128x128xf32, #tpu.memory_space<vmem>>, %arg3: memref<1x128xf32, #tpu.memory_space<vmem>>, %arg4: memref<4x128x32xf32, #tpu.memory_space<vmem>>, %arg5: memref<4x1x32xf32, #tpu.memory_space<vmem>>, %arg6: memref<4x128x32xf32, #tpu.memory_space<vmem>>, %arg7: memref<4x1x32xf32, #tpu.memory_space<vmem>>, %arg8: memref<4x128x32xf32, #tpu.memory_space<vmem>>, %arg9: memref<4x1x32xf32, #tpu.memory_space<vmem>>, %arg10: memref<4x32x128xf32, #tpu.memory_space<vmem>>, %arg11: memref<1x128xf32, #tpu.memory_space<vmem>>, %arg12: memref<1x8x128xf32, #tpu.memory_space<vmem>>) attributes {dimension_semantics = [#tpu.dimension_semantics<parallel>], iteration_bounds = array<i64: 2>, scalar_prefetch = 0 : i64, scratch_operands = 0 : i64, tpu.core_type = #tpu.core_type<tc>, window_params = [{transform_indices = @transform_0, window_bounds = array<i64: 1, 8, 128>}, {pipeline_mode = #tpu.pipeline_mode<synchronous>, transform_indices = @transform_1, window_bounds = array<i64: 128, 128>}, {pipeline_mode = #tpu.pipeline_mode<synchronous>, transform_indices = @transform_2, window_bounds = array<i64: 1, 128>}, {pipeline_mode = #tpu.pipeline_mode<synchronous>, transform_indices = @transform_3, window_bounds = array<i64: 4, 128, 32>}, {pipeline_mode = #tpu.pipeline_mode<synchronous>, transform_indices = @transform_4, window_bounds = array<i64: 4, 1, 32>}, {pipeline_mode = #tpu.pipeline_mode<synchronous>, transform_indices = @transform_5, window_bounds = array<i64: 4, 128, 32>}, {pipeline_mode = #tpu.pipeline_mode<synchronous>, transform_indices = @transform_6, window_bounds = array<i64: 4, 1, 32>}, {pipeline_mode = #tpu.pipeline_mode<synchronous>, transform_indices = @transform_7, window_bounds = array<i64: 4, 128, 32>}, {pipeline_mode = #tpu.pipeline_mode<synchronous>, transform_indices = @transform_8, window_bounds = array<i64: 4, 1, 32>}, {pipeline_mode = #tpu.pipeline_mode<synchronous>, transform_indices = @transform_9, window_bounds = array<i64: 4, 32, 128>}, {pipeline_mode = #tpu.pipeline_mode<synchronous>, transform_indices = @transform_10, window_bounds = array<i64: 1, 128>}, {transform_indices = @transform_11, window_bounds = array<i64: 1, 8, 128>}]} {
    %c0 = arith.constant 0 : index
    %c0_0 = arith.constant 0 : index
    %c0_1 = arith.constant 0 : index
    %0 = vector.load %arg1[%c0, %c0_0, %c0_1] : memref<1x8x128xf32, #tpu.memory_space<vmem>>, vector<1x8x128xf32>
    %1 = vector.shape_cast %0 : vector<1x8x128xf32> to vector<8x128xf32>
    %c0_2 = arith.constant 0 : index
    %c0_3 = arith.constant 0 : index
    %2 = vector.load %arg2[%c0_2, %c0_3] : memref<128x128xf32, #tpu.memory_space<vmem>>, vector<128x128xf32>
    %cst = arith.constant dense<0.000000e+00> : vector<8x128xf32>
    %3 = tpu.matmul %1, %2, %cst {dimension_numbers = #tpu.dot_dimension_numbers<[1], [0], [0], [1], [0, 0, 1, 1], [], []>} : vector<8x128xf32>, vector<128x128xf32>, vector<8x128xf32> -> vector<8x128xf32>
    %c0_4 = arith.constant 0 : index
    %c0_5 = arith.constant 0 : index
    %4 = vector.load %arg3[%c0_4, %c0_5] : memref<1x128xf32, #tpu.memory_space<vmem>>, vector<1x128xf32>
    %5 = vector.broadcast %4 : vector<1x128xf32> to vector<8x128xf32>
    %6 = arith.addf %3, %5 : vector<8x128xf32>
    %cst_6 = arith.constant 0.000000e+00 : f32
    %7 = vector.broadcast %cst_6 : f32 to vector<8x128xf32>
    %c0_7 = arith.constant 0 : index
    %c0_8 = arith.constant 0 : index
    %c0_9 = arith.constant 0 : index
    %8 = vector.load %arg4[%c0_7, %c0_8, %c0_9] : memref<4x128x32xf32, #tpu.memory_space<vmem>>, vector<1x128x32xf32>
    %9 = vector.shape_cast %8 : vector<1x128x32xf32> to vector<128x32xf32>
    %cst_10 = arith.constant dense<0.000000e+00> : vector<8x32xf32>
    %10 = tpu.matmul %6, %9, %cst_10 {dimension_numbers = #tpu.dot_dimension_numbers<[1], [0], [0], [1], [0, 0, 1, 1], [], []>} : vector<8x128xf32>, vector<128x32xf32>, vector<8x32xf32> -> vector<8x32xf32>
    %c0_11 = arith.constant 0 : index
    %c0_12 = arith.constant 0 : index
    %c0_13 = arith.constant 0 : index
    %11 = vector.load %arg5[%c0_11, %c0_12, %c0_13] : memref<4x1x32xf32, #tpu.memory_space<vmem>>, vector<1x1x32xf32>
    %12 = vector.shape_cast %11 : vector<1x1x32xf32> to vector<1x32xf32>
    %13 = vector.broadcast %12 : vector<1x32xf32> to vector<8x32xf32>
    %14 = arith.addf %10, %13 : vector<8x32xf32>
    %cst_14 = arith.constant 0.176776692 : f32
    %15 = vector.broadcast %cst_14 : f32 to vector<8x32xf32>
    %16 = arith.mulf %14, %15 : vector<8x32xf32>
    %c0_15 = arith.constant 0 : index
    %c0_16 = arith.constant 0 : index
    %c0_17 = arith.constant 0 : index
    %17 = vector.load %arg6[%c0_15, %c0_16, %c0_17] : memref<4x128x32xf32, #tpu.memory_space<vmem>>, vector<1x128x32xf32>
    %18 = vector.shape_cast %17 : vector<1x128x32xf32> to vector<128x32xf32>
    %cst_18 = arith.constant dense<0.000000e+00> : vector<8x32xf32>
    %19 = tpu.matmul %6, %18, %cst_18 {dimension_numbers = #tpu.dot_dimension_numbers<[1], [0], [0], [1], [0, 0, 1, 1], [], []>} : vector<8x128xf32>, vector<128x32xf32>, vector<8x32xf32> -> vector<8x32xf32>
    %c0_19 = arith.constant 0 : index
    %c0_20 = arith.constant 0 : index
    %c0_21 = arith.constant 0 : index
    %20 = vector.load %arg7[%c0_19, %c0_20, %c0_21] : memref<4x1x32xf32, #tpu.memory_space<vmem>>, vector<1x1x32xf32>
    %21 = vector.shape_cast %20 : vector<1x1x32xf32> to vector<1x32xf32>
    %22 = vector.broadcast %21 : vector<1x32xf32> to vector<8x32xf32>
    %23 = arith.addf %19, %22 : vector<8x32xf32>
    %c0_22 = arith.constant 0 : index
    %c0_23 = arith.constant 0 : index
    %c0_24 = arith.constant 0 : index
    %24 = vector.load %arg8[%c0_22, %c0_23, %c0_24] : memref<4x128x32xf32, #tpu.memory_space<vmem>>, vector<1x128x32xf32>
    %25 = vector.shape_cast %24 : vector<1x128x32xf32> to vector<128x32xf32>
    %cst_25 = arith.constant dense<0.000000e+00> : vector<8x32xf32>
    %26 = tpu.matmul %6, %25, %cst_25 {dimension_numbers = #tpu.dot_dimension_numbers<[1], [0], [0], [1], [0, 0, 1, 1], [], []>} : vector<8x128xf32>, vector<128x32xf32>, vector<8x32xf32> -> vector<8x32xf32>
    %c0_26 = arith.constant 0 : index
    %c0_27 = arith.constant 0 : index
    %c0_28 = arith.constant 0 : index
    %27 = vector.load %arg9[%c0_26, %c0_27, %c0_28] : memref<4x1x32xf32, #tpu.memory_space<vmem>>, vector<1x1x32xf32>
    %28 = vector.shape_cast %27 : vector<1x1x32xf32> to vector<1x32xf32>
    %29 = vector.broadcast %28 : vector<1x32xf32> to vector<8x32xf32>
    %30 = arith.addf %26, %29 : vector<8x32xf32>
    %cst_29 = arith.constant dense<0.000000e+00> : vector<8x8xf32>
    %31 = tpu.matmul %16, %23, %cst_29 {dimension_numbers = #tpu.dot_dimension_numbers<[1], [1], [0], [0], [0, 0, 1, 0], [], []>} : vector<8x32xf32>, vector<8x32xf32>, vector<8x8xf32> -> vector<8x8xf32>
    %cst_30 = arith.constant dense<0xFF800000> : vector<8xf32>
    %32 = vector.multi_reduction <maximumf>, %31, %cst_30 [1] : vector<8x8xf32> to vector<8xf32>
    %33 = vector.shape_cast %32 : vector<8xf32> to vector<8x1xf32>
    %34 = vector.broadcast %33 : vector<8x1xf32> to vector<8x8xf32>
    %35 = arith.subf %31, %34 : vector<8x8xf32>
    %36 = math.exp %35 : vector<8x8xf32>
    %cst_31 = arith.constant dense<0.000000e+00> : vector<8xf32>
    %37 = vector.multi_reduction <add>, %36, %cst_31 [1] : vector<8x8xf32> to vector<8xf32>
    %38 = vector.shape_cast %37 : vector<8xf32> to vector<8x1xf32>
    %39 = tpu.reciprocal %38 {approx = true} : vector<8x1xf32> -> vector<8x1xf32>
    %40 = vector.broadcast %39 : vector<8x1xf32> to vector<8x8xf32>
    %41 = arith.mulf %36, %40 : vector<8x8xf32>
    %cst_32 = arith.constant dense<0.000000e+00> : vector<8x32xf32>
    %42 = tpu.matmul %41, %30, %cst_32 {dimension_numbers = #tpu.dot_dimension_numbers<[1], [0], [0], [1], [0, 0, 1, 1], [], []>} : vector<8x8xf32>, vector<8x32xf32>, vector<8x32xf32> -> vector<8x32xf32>
    %c0_33 = arith.constant 0 : index
    %c0_34 = arith.constant 0 : index
    %c0_35 = arith.constant 0 : index
    %43 = vector.load %arg10[%c0_33, %c0_34, %c0_35] : memref<4x32x128xf32, #tpu.memory_space<vmem>>, vector<1x32x128xf32>
    %44 = vector.shape_cast %43 : vector<1x32x128xf32> to vector<32x128xf32>
    %cst_36 = arith.constant dense<0.000000e+00> : vector<8x128xf32>
    %45 = tpu.matmul %42, %44, %cst_36 {dimension_numbers = #tpu.dot_dimension_numbers<[1], [0], [0], [1], [0, 0, 1, 1], [], []>} : vector<8x32xf32>, vector<32x128xf32>, vector<8x128xf32> -> vector<8x128xf32>
    %46 = arith.addf %7, %45 : vector<8x128xf32>
    %c1 = arith.constant 1 : index
    %c0_37 = arith.constant 0 : index
    %c0_38 = arith.constant 0 : index
    %47 = vector.load %arg4[%c1, %c0_37, %c0_38] : memref<4x128x32xf32, #tpu.memory_space<vmem>>, vector<1x128x32xf32>
    %48 = vector.shape_cast %47 : vector<1x128x32xf32> to vector<128x32xf32>
    %cst_39 = arith.constant dense<0.000000e+00> : vector<8x32xf32>
    %49 = tpu.matmul %6, %48, %cst_39 {dimension_numbers = #tpu.dot_dimension_numbers<[1], [0], [0], [1], [0, 0, 1, 1], [], []>} : vector<8x128xf32>, vector<128x32xf32>, vector<8x32xf32> -> vector<8x32xf32>
    %c1_40 = arith.constant 1 : index
    %c0_41 = arith.constant 0 : index
    %c0_42 = arith.constant 0 : index
    %50 = vector.load %arg5[%c1_40, %c0_41, %c0_42] : memref<4x1x32xf32, #tpu.memory_space<vmem>>, vector<1x1x32xf32>
    %51 = vector.shape_cast %50 : vector<1x1x32xf32> to vector<1x32xf32>
    %52 = vector.broadcast %51 : vector<1x32xf32> to vector<8x32xf32>
    %53 = arith.addf %49, %52 : vector<8x32xf32>
    %cst_43 = arith.constant 0.176776692 : f32
    %54 = vector.broadcast %cst_43 : f32 to vector<8x32xf32>
    %55 = arith.mulf %53, %54 : vector<8x32xf32>
    %c1_44 = arith.constant 1 : index
    %c0_45 = arith.constant 0 : index
    %c0_46 = arith.constant 0 : index
    %56 = vector.load %arg6[%c1_44, %c0_45, %c0_46] : memref<4x128x32xf32, #tpu.memory_space<vmem>>, vector<1x128x32xf32>
    %57 = vector.shape_cast %56 : vector<1x128x32xf32> to vector<128x32xf32>
    %cst_47 = arith.constant dense<0.000000e+00> : vector<8x32xf32>
    %58 = tpu.matmul %6, %57, %cst_47 {dimension_numbers = #tpu.dot_dimension_numbers<[1], [0], [0], [1], [0, 0, 1, 1], [], []>} : vector<8x128xf32>, vector<128x32xf32>, vector<8x32xf32> -> vector<8x32xf32>
    %c1_48 = arith.constant 1 : index
    %c0_49 = arith.constant 0 : index
    %c0_50 = arith.constant 0 : index
    %59 = vector.load %arg7[%c1_48, %c0_49, %c0_50] : memref<4x1x32xf32, #tpu.memory_space<vmem>>, vector<1x1x32xf32>
    %60 = vector.shape_cast %59 : vector<1x1x32xf32> to vector<1x32xf32>
    %61 = vector.broadcast %60 : vector<1x32xf32> to vector<8x32xf32>
    %62 = arith.addf %58, %61 : vector<8x32xf32>
    %c1_51 = arith.constant 1 : index
    %c0_52 = arith.constant 0 : index
    %c0_53 = arith.constant 0 : index
    %63 = vector.load %arg8[%c1_51, %c0_52, %c0_53] : memref<4x128x32xf32, #tpu.memory_space<vmem>>, vector<1x128x32xf32>
    %64 = vector.shape_cast %63 : vector<1x128x32xf32> to vector<128x32xf32>
    %cst_54 = arith.constant dense<0.000000e+00> : vector<8x32xf32>
    %65 = tpu.matmul %6, %64, %cst_54 {dimension_numbers = #tpu.dot_dimension_numbers<[1], [0], [0], [1], [0, 0, 1, 1], [], []>} : vector<8x128xf32>, vector<128x32xf32>, vector<8x32xf32> -> vector<8x32xf32>
    %c1_55 = arith.constant 1 : index
    %c0_56 = arith.constant 0 : index
    %c0_57 = arith.constant 0 : index
    %66 = vector.load %arg9[%c1_55, %c0_56, %c0_57] : memref<4x1x32xf32, #tpu.memory_space<vmem>>, vector<1x1x32xf32>
    %67 = vector.shape_cast %66 : vector<1x1x32xf32> to vector<1x32xf32>
    %68 = vector.broadcast %67 : vector<1x32xf32> to vector<8x32xf32>
    %69 = arith.addf %65, %68 : vector<8x32xf32>
    %cst_58 = arith.constant dense<0.000000e+00> : vector<8x8xf32>
    %70 = tpu.matmul %55, %62, %cst_58 {dimension_numbers = #tpu.dot_dimension_numbers<[1], [1], [0], [0], [0, 0, 1, 0], [], []>} : vector<8x32xf32>, vector<8x32xf32>, vector<8x8xf32> -> vector<8x8xf32>
    %cst_59 = arith.constant dense<0xFF800000> : vector<8xf32>
    %71 = vector.multi_reduction <maximumf>, %70, %cst_59 [1] : vector<8x8xf32> to vector<8xf32>
    %72 = vector.shape_cast %71 : vector<8xf32> to vector<8x1xf32>
    %73 = vector.broadcast %72 : vector<8x1xf32> to vector<8x8xf32>
    %74 = arith.subf %70, %73 : vector<8x8xf32>
    %75 = math.exp %74 : vector<8x8xf32>
    %cst_60 = arith.constant dense<0.000000e+00> : vector<8xf32>
    %76 = vector.multi_reduction <add>, %75, %cst_60 [1] : vector<8x8xf32> to vector<8xf32>
    %77 = vector.shape_cast %76 : vector<8xf32> to vector<8x1xf32>
    %78 = tpu.reciprocal %77 {approx = true} : vector<8x1xf32> -> vector<8x1xf32>
    %79 = vector.broadcast %78 : vector<8x1xf32> to vector<8x8xf32>
    %80 = arith.mulf %75, %79 : vector<8x8xf32>
    %cst_61 = arith.constant dense<0.000000e+00> : vector<8x32xf32>
    %81 = tpu.matmul %80, %69, %cst_61 {dimension_numbers = #tpu.dot_dimension_numbers<[1], [0], [0], [1], [0, 0, 1, 1], [], []>} : vector<8x8xf32>, vector<8x32xf32>, vector<8x32xf32> -> vector<8x32xf32>
    %c1_62 = arith.constant 1 : index
    %c0_63 = arith.constant 0 : index
    %c0_64 = arith.constant 0 : index
    %82 = vector.load %arg10[%c1_62, %c0_63, %c0_64] : memref<4x32x128xf32, #tpu.memory_space<vmem>>, vector<1x32x128xf32>
    %83 = vector.shape_cast %82 : vector<1x32x128xf32> to vector<32x128xf32>
    %cst_65 = arith.constant dense<0.000000e+00> : vector<8x128xf32>
    %84 = tpu.matmul %81, %83, %cst_65 {dimension_numbers = #tpu.dot_dimension_numbers<[1], [0], [0], [1], [0, 0, 1, 1], [], []>} : vector<8x32xf32>, vector<32x128xf32>, vector<8x128xf32> -> vector<8x128xf32>
    %85 = arith.addf %46, %84 : vector<8x128xf32>
    %c2 = arith.constant 2 : index
    %c0_66 = arith.constant 0 : index
    %c0_67 = arith.constant 0 : index
    %86 = vector.load %arg4[%c2, %c0_66, %c0_67] : memref<4x128x32xf32, #tpu.memory_space<vmem>>, vector<1x128x32xf32>
    %87 = vector.shape_cast %86 : vector<1x128x32xf32> to vector<128x32xf32>
    %cst_68 = arith.constant dense<0.000000e+00> : vector<8x32xf32>
    %88 = tpu.matmul %6, %87, %cst_68 {dimension_numbers = #tpu.dot_dimension_numbers<[1], [0], [0], [1], [0, 0, 1, 1], [], []>} : vector<8x128xf32>, vector<128x32xf32>, vector<8x32xf32> -> vector<8x32xf32>
    %c2_69 = arith.constant 2 : index
    %c0_70 = arith.constant 0 : index
    %c0_71 = arith.constant 0 : index
    %89 = vector.load %arg5[%c2_69, %c0_70, %c0_71] : memref<4x1x32xf32, #tpu.memory_space<vmem>>, vector<1x1x32xf32>
    %90 = vector.shape_cast %89 : vector<1x1x32xf32> to vector<1x32xf32>
    %91 = vector.broadcast %90 : vector<1x32xf32> to vector<8x32xf32>
    %92 = arith.addf %88, %91 : vector<8x32xf32>
    %cst_72 = arith.constant 0.176776692 : f32
    %93 = vector.broadcast %cst_72 : f32 to vector<8x32xf32>
    %94 = arith.mulf %92, %93 : vector<8x32xf32>
    %c2_73 = arith.constant 2 : index
    %c0_74 = arith.constant 0 : index
    %c0_75 = arith.constant 0 : index
    %95 = vector.load %arg6[%c2_73, %c0_74, %c0_75] : memref<4x128x32xf32, #tpu.memory_space<vmem>>, vector<1x128x32xf32>
    %96 = vector.shape_cast %95 : vector<1x128x32xf32> to vector<128x32xf32>
    %cst_76 = arith.constant dense<0.000000e+00> : vector<8x32xf32>
    %97 = tpu.matmul %6, %96, %cst_76 {dimension_numbers = #tpu.dot_dimension_numbers<[1], [0], [0], [1], [0, 0, 1, 1], [], []>} : vector<8x128xf32>, vector<128x32xf32>, vector<8x32xf32> -> vector<8x32xf32>
    %c2_77 = arith.constant 2 : index
    %c0_78 = arith.constant 0 : index
    %c0_79 = arith.constant 0 : index
    %98 = vector.load %arg7[%c2_77, %c0_78, %c0_79] : memref<4x1x32xf32, #tpu.memory_space<vmem>>, vector<1x1x32xf32>
    %99 = vector.shape_cast %98 : vector<1x1x32xf32> to vector<1x32xf32>
    %100 = vector.broadcast %99 : vector<1x32xf32> to vector<8x32xf32>
    %101 = arith.addf %97, %100 : vector<8x32xf32>
    %c2_80 = arith.constant 2 : index
    %c0_81 = arith.constant 0 : index
    %c0_82 = arith.constant 0 : index
    %102 = vector.load %arg8[%c2_80, %c0_81, %c0_82] : memref<4x128x32xf32, #tpu.memory_space<vmem>>, vector<1x128x32xf32>
    %103 = vector.shape_cast %102 : vector<1x128x32xf32> to vector<128x32xf32>
    %cst_83 = arith.constant dense<0.000000e+00> : vector<8x32xf32>
    %104 = tpu.matmul %6, %103, %cst_83 {dimension_numbers = #tpu.dot_dimension_numbers<[1], [0], [0], [1], [0, 0, 1, 1], [], []>} : vector<8x128xf32>, vector<128x32xf32>, vector<8x32xf32> -> vector<8x32xf32>
    %c2_84 = arith.constant 2 : index
    %c0_85 = arith.constant 0 : index
    %c0_86 = arith.constant 0 : index
    %105 = vector.load %arg9[%c2_84, %c0_85, %c0_86] : memref<4x1x32xf32, #tpu.memory_space<vmem>>, vector<1x1x32xf32>
    %106 = vector.shape_cast %105 : vector<1x1x32xf32> to vector<1x32xf32>
    %107 = vector.broadcast %106 : vector<1x32xf32> to vector<8x32xf32>
    %108 = arith.addf %104, %107 : vector<8x32xf32>
    %cst_87 = arith.constant dense<0.000000e+00> : vector<8x8xf32>
    %109 = tpu.matmul %94, %101, %cst_87 {dimension_numbers = #tpu.dot_dimension_numbers<[1], [1], [0], [0], [0, 0, 1, 0], [], []>} : vector<8x32xf32>, vector<8x32xf32>, vector<8x8xf32> -> vector<8x8xf32>
    %cst_88 = arith.constant dense<0xFF800000> : vector<8xf32>
    %110 = vector.multi_reduction <maximumf>, %109, %cst_88 [1] : vector<8x8xf32> to vector<8xf32>
    %111 = vector.shape_cast %110 : vector<8xf32> to vector<8x1xf32>
    %112 = vector.broadcast %111 : vector<8x1xf32> to vector<8x8xf32>
    %113 = arith.subf %109, %112 : vector<8x8xf32>
    %114 = math.exp %113 : vector<8x8xf32>
    %cst_89 = arith.constant dense<0.000000e+00> : vector<8xf32>
    %115 = vector.multi_reduction <add>, %114, %cst_89 [1] : vector<8x8xf32> to vector<8xf32>
    %116 = vector.shape_cast %115 : vector<8xf32> to vector<8x1xf32>
    %117 = tpu.reciprocal %116 {approx = true} : vector<8x1xf32> -> vector<8x1xf32>
    %118 = vector.broadcast %117 : vector<8x1xf32> to vector<8x8xf32>
    %119 = arith.mulf %114, %118 : vector<8x8xf32>
    %cst_90 = arith.constant dense<0.000000e+00> : vector<8x32xf32>
    %120 = tpu.matmul %119, %108, %cst_90 {dimension_numbers = #tpu.dot_dimension_numbers<[1], [0], [0], [1], [0, 0, 1, 1], [], []>} : vector<8x8xf32>, vector<8x32xf32>, vector<8x32xf32> -> vector<8x32xf32>
    %c2_91 = arith.constant 2 : index
    %c0_92 = arith.constant 0 : index
    %c0_93 = arith.constant 0 : index
    %121 = vector.load %arg10[%c2_91, %c0_92, %c0_93] : memref<4x32x128xf32, #tpu.memory_space<vmem>>, vector<1x32x128xf32>
    %122 = vector.shape_cast %121 : vector<1x32x128xf32> to vector<32x128xf32>
    %cst_94 = arith.constant dense<0.000000e+00> : vector<8x128xf32>
    %123 = tpu.matmul %120, %122, %cst_94 {dimension_numbers = #tpu.dot_dimension_numbers<[1], [0], [0], [1], [0, 0, 1, 1], [], []>} : vector<8x32xf32>, vector<32x128xf32>, vector<8x128xf32> -> vector<8x128xf32>
    %124 = arith.addf %85, %123 : vector<8x128xf32>
    %c3 = arith.constant 3 : index
    %c0_95 = arith.constant 0 : index
    %c0_96 = arith.constant 0 : index
    %125 = vector.load %arg4[%c3, %c0_95, %c0_96] : memref<4x128x32xf32, #tpu.memory_space<vmem>>, vector<1x128x32xf32>
    %126 = vector.shape_cast %125 : vector<1x128x32xf32> to vector<128x32xf32>
    %cst_97 = arith.constant dense<0.000000e+00> : vector<8x32xf32>
    %127 = tpu.matmul %6, %126, %cst_97 {dimension_numbers = #tpu.dot_dimension_numbers<[1], [0], [0], [1], [0, 0, 1, 1], [], []>} : vector<8x128xf32>, vector<128x32xf32>, vector<8x32xf32> -> vector<8x32xf32>
    %c3_98 = arith.constant 3 : index
    %c0_99 = arith.constant 0 : index
    %c0_100 = arith.constant 0 : index
    %128 = vector.load %arg5[%c3_98, %c0_99, %c0_100] : memref<4x1x32xf32, #tpu.memory_space<vmem>>, vector<1x1x32xf32>
    %129 = vector.shape_cast %128 : vector<1x1x32xf32> to vector<1x32xf32>
    %130 = vector.broadcast %129 : vector<1x32xf32> to vector<8x32xf32>
    %131 = arith.addf %127, %130 : vector<8x32xf32>
    %cst_101 = arith.constant 0.176776692 : f32
    %132 = vector.broadcast %cst_101 : f32 to vector<8x32xf32>
    %133 = arith.mulf %131, %132 : vector<8x32xf32>
    %c3_102 = arith.constant 3 : index
    %c0_103 = arith.constant 0 : index
    %c0_104 = arith.constant 0 : index
    %134 = vector.load %arg6[%c3_102, %c0_103, %c0_104] : memref<4x128x32xf32, #tpu.memory_space<vmem>>, vector<1x128x32xf32>
    %135 = vector.shape_cast %134 : vector<1x128x32xf32> to vector<128x32xf32>
    %cst_105 = arith.constant dense<0.000000e+00> : vector<8x32xf32>
    %136 = tpu.matmul %6, %135, %cst_105 {dimension_numbers = #tpu.dot_dimension_numbers<[1], [0], [0], [1], [0, 0, 1, 1], [], []>} : vector<8x128xf32>, vector<128x32xf32>, vector<8x32xf32> -> vector<8x32xf32>
    %c3_106 = arith.constant 3 : index
    %c0_107 = arith.constant 0 : index
    %c0_108 = arith.constant 0 : index
    %137 = vector.load %arg7[%c3_106, %c0_107, %c0_108] : memref<4x1x32xf32, #tpu.memory_space<vmem>>, vector<1x1x32xf32>
    %138 = vector.shape_cast %137 : vector<1x1x32xf32> to vector<1x32xf32>
    %139 = vector.broadcast %138 : vector<1x32xf32> to vector<8x32xf32>
    %140 = arith.addf %136, %139 : vector<8x32xf32>
    %c3_109 = arith.constant 3 : index
    %c0_110 = arith.constant 0 : index
    %c0_111 = arith.constant 0 : index
    %141 = vector.load %arg8[%c3_109, %c0_110, %c0_111] : memref<4x128x32xf32, #tpu.memory_space<vmem>>, vector<1x128x32xf32>
    %142 = vector.shape_cast %141 : vector<1x128x32xf32> to vector<128x32xf32>
    %cst_112 = arith.constant dense<0.000000e+00> : vector<8x32xf32>
    %143 = tpu.matmul %6, %142, %cst_112 {dimension_numbers = #tpu.dot_dimension_numbers<[1], [0], [0], [1], [0, 0, 1, 1], [], []>} : vector<8x128xf32>, vector<128x32xf32>, vector<8x32xf32> -> vector<8x32xf32>
    %c3_113 = arith.constant 3 : index
    %c0_114 = arith.constant 0 : index
    %c0_115 = arith.constant 0 : index
    %144 = vector.load %arg9[%c3_113, %c0_114, %c0_115] : memref<4x1x32xf32, #tpu.memory_space<vmem>>, vector<1x1x32xf32>
    %145 = vector.shape_cast %144 : vector<1x1x32xf32> to vector<1x32xf32>
    %146 = vector.broadcast %145 : vector<1x32xf32> to vector<8x32xf32>
    %147 = arith.addf %143, %146 : vector<8x32xf32>
    %cst_116 = arith.constant dense<0.000000e+00> : vector<8x8xf32>
    %148 = tpu.matmul %133, %140, %cst_116 {dimension_numbers = #tpu.dot_dimension_numbers<[1], [1], [0], [0], [0, 0, 1, 0], [], []>} : vector<8x32xf32>, vector<8x32xf32>, vector<8x8xf32> -> vector<8x8xf32>
    %cst_117 = arith.constant dense<0xFF800000> : vector<8xf32>
    %149 = vector.multi_reduction <maximumf>, %148, %cst_117 [1] : vector<8x8xf32> to vector<8xf32>
    %150 = vector.shape_cast %149 : vector<8xf32> to vector<8x1xf32>
    %151 = vector.broadcast %150 : vector<8x1xf32> to vector<8x8xf32>
    %152 = arith.subf %148, %151 : vector<8x8xf32>
    %153 = math.exp %152 : vector<8x8xf32>
    %cst_118 = arith.constant dense<0.000000e+00> : vector<8xf32>
    %154 = vector.multi_reduction <add>, %153, %cst_118 [1] : vector<8x8xf32> to vector<8xf32>
    %155 = vector.shape_cast %154 : vector<8xf32> to vector<8x1xf32>
    %156 = tpu.reciprocal %155 {approx = true} : vector<8x1xf32> -> vector<8x1xf32>
    %157 = vector.broadcast %156 : vector<8x1xf32> to vector<8x8xf32>
    %158 = arith.mulf %153, %157 : vector<8x8xf32>
    %cst_119 = arith.constant dense<0.000000e+00> : vector<8x32xf32>
    %159 = tpu.matmul %158, %147, %cst_119 {dimension_numbers = #tpu.dot_dimension_numbers<[1], [0], [0], [1], [0, 0, 1, 1], [], []>} : vector<8x8xf32>, vector<8x32xf32>, vector<8x32xf32> -> vector<8x32xf32>
    %c3_120 = arith.constant 3 : index
    %c0_121 = arith.constant 0 : index
    %c0_122 = arith.constant 0 : index
    %160 = vector.load %arg10[%c3_120, %c0_121, %c0_122] : memref<4x32x128xf32, #tpu.memory_space<vmem>>, vector<1x32x128xf32>
    %161 = vector.shape_cast %160 : vector<1x32x128xf32> to vector<32x128xf32>
    %cst_123 = arith.constant dense<0.000000e+00> : vector<8x128xf32>
    %162 = tpu.matmul %159, %161, %cst_123 {dimension_numbers = #tpu.dot_dimension_numbers<[1], [0], [0], [1], [0, 0, 1, 1], [], []>} : vector<8x32xf32>, vector<32x128xf32>, vector<8x128xf32> -> vector<8x128xf32>
    %163 = arith.addf %124, %162 : vector<8x128xf32>
    %c0_124 = arith.constant 0 : index
    %c0_125 = arith.constant 0 : index
    %164 = vector.load %arg11[%c0_124, %c0_125] : memref<1x128xf32, #tpu.memory_space<vmem>>, vector<1x128xf32>
    %165 = vector.broadcast %164 : vector<1x128xf32> to vector<8x128xf32>
    %166 = arith.addf %163, %165 : vector<8x128xf32>
    %c0_126 = arith.constant 0 : index
    %c0_127 = arith.constant 0 : index
    %c0_128 = arith.constant 0 : index
    %167 = vector.load %arg12[%c0_126, %c0_127, %c0_128] : memref<1x8x128xf32, #tpu.memory_space<vmem>>, vector<1x8x128xf32>
    %168 = vector.shape_cast %167 : vector<1x8x128xf32> to vector<8x128xf32>
    %169 = vector.shape_cast %166 : vector<8x128xf32> to vector<1x8x128xf32>
    tpu.vector_store %arg12[%c0_126, %c0_127, %c0_128], %169 {strides = array<i32>} : memref<1x8x128xf32, #tpu.memory_space<vmem>>, vector<1x8x128xf32>,
    return
  }
  func.func @transform_0(%arg0: i32) -> (i32, i32, i32) {
    %c0_i32 = arith.constant 0 : i32
    %c0_i32_0 = arith.constant 0 : i32
    %c0_i32_1 = arith.constant 0 : i32
    return %arg0, %c0_i32, %c0_i32_0 : i32, i32, i32
  }
  func.func @transform_1(%arg0: i32) -> (i32, i32) {
    %c0_i32 = arith.constant 0 : i32
    %c0_i32_0 = arith.constant 0 : i32
    %c0_i32_1 = arith.constant 0 : i32
    return %c0_i32, %c0_i32_0 : i32, i32
  }
  func.func @transform_2(%arg0: i32) -> (i32, i32) {
    %c0_i32 = arith.constant 0 : i32
    %c0_i32_0 = arith.constant 0 : i32
    %c0_i32_1 = arith.constant 0 : i32
    return %c0_i32, %c0_i32_0 : i32, i32
  }
  func.func @transform_3(%arg0: i32) -> (i32, i32, i32) {
    %c0_i32 = arith.constant 0 : i32
    %c0_i32_0 = arith.constant 0 : i32
    %c0_i32_1 = arith.constant 0 : i32
    %c0_i32_2 = arith.constant 0 : i32
    return %c0_i32, %c0_i32_0, %c0_i32_1 : i32, i32, i32
  }
  func.func @transform_4(%arg0: i32) -> (i32, i32, i32) {
    %c0_i32 = arith.constant 0 : i32
    %c0_i32_0 = arith.constant 0 : i32
    %c0_i32_1 = arith.constant 0 : i32
    %c0_i32_2 = arith.constant 0 : i32
    return %c0_i32, %c0_i32_0, %c0_i32_1 : i32, i32, i32
  }
  func.func @transform_5(%arg0: i32) -> (i32, i32, i32) {
    %c0_i32 = arith.constant 0 : i32
    %c0_i32_0 = arith.constant 0 : i32
    %c0_i32_1 = arith.constant 0 : i32
    %c0_i32_2 = arith.constant 0 : i32
    return %c0_i32, %c0_i32_0, %c0_i32_1 : i32, i32, i32
  }
  func.func @transform_6(%arg0: i32) -> (i32, i32, i32) {
    %c0_i32 = arith.constant 0 : i32
    %c0_i32_0 = arith.constant 0 : i32
    %c0_i32_1 = arith.constant 0 : i32
    %c0_i32_2 = arith.constant 0 : i32
    return %c0_i32, %c0_i32_0, %c0_i32_1 : i32, i32, i32
  }
  func.func @transform_7(%arg0: i32) -> (i32, i32, i32) {
    %c0_i32 = arith.constant 0 : i32
    %c0_i32_0 = arith.constant 0 : i32
    %c0_i32_1 = arith.constant 0 : i32
    %c0_i32_2 = arith.constant 0 : i32
    return %c0_i32, %c0_i32_0, %c0_i32_1 : i32, i32, i32
  }
  func.func @transform_8(%arg0: i32) -> (i32, i32, i32) {
    %c0_i32 = arith.constant 0 : i32
    %c0_i32_0 = arith.constant 0 : i32
    %c0_i32_1 = arith.constant 0 : i32
    %c0_i32_2 = arith.constant 0 : i32
    return %c0_i32, %c0_i32_0, %c0_i32_1 : i32, i32, i32
  }
  func.func @transform_9(%arg0: i32) -> (i32, i32, i32) {
    %c0_i32 = arith.constant 0 : i32
    %c0_i32_0 = arith.constant 0 : i32
    %c0_i32_1 = arith.constant 0 : i32
    %c0_i32_2 = arith.constant 0 : i32
    return %c0_i32, %c0_i32_0, %c0_i32_1 : i32, i32, i32
  }
  func.func @transform_10(%arg0: i32) -> (i32, i32) {
    %c0_i32 = arith.constant 0 : i32
    %c0_i32_0 = arith.constant 0 : i32
    %c0_i32_1 = arith.constant 0 : i32
    return %c0_i32, %c0_i32_0 : i32, i32
  }
  func.func @transform_11(%arg0: i32) -> (i32, i32, i32) {
    %c0_i32 = arith.constant 0 : i32
    %c0_i32_0 = arith.constant 0 : i32
    %c0_i32_1 = arith.constant 0 : i32
    return %arg0, %c0_i32, %c0_i32_0 : i32, i32, i32
  }
}

</mosaic_0001>

<bundles_post_ra>
// kernel: tpu_custom_call.1
= control target key start
LH: loop header
LB: loop body
LE: loop exit
PB: predicated region body
PF: predicated region fallthrough
CT: control target
= control target key end

     0   :  { %s5208_s0 = inlined_call_operand.vmem [shape: f32[2,8,128], index: 0, kind: input, shape index: {}]   ;;  %s5209_s1 = inlined_call_operand.vmem [shape: f32[128,128], index: 1, kind: input, shape index: {}]   ;;  %s5210_s2 = inlined_call_operand.vmem [shape: f32[1,128], index: 2, kind: input, shape index: {}]   ;;  %s5211_s3 = inlined_call_operand.vmem [shape: f32[4,128,32], index: 3, kind: input, shape index: {}]   ;;  %s5212_s4 = inlined_call_operand.vmem [shape: f32[4,1,32], index: 4, kind: input, shape index: {}]   ;;  %s5213_s5 = inlined_call_operand.vmem [shape: f32[4,128,32], index: 5, kind: input, shape index: {}]   ;;  %s5214_s6 = inlined_call_operand.vmem [shape: f32[4,1,32], index: 6, kind: input, shape index: {}]   ;;  %s5215_s7 = inlined_call_operand.vmem [shape: f32[4,128,32], index: 7, kind: input, shape index: {}]   ;;  %s5216_s8 = inlined_call_operand.vmem [shape: f32[4,1,32], index: 8, kind: input, shape index: {}]   ;;  %s5217_s9 = inlined_call_operand.vmem [shape: f32[4,32,128], index: 9, kind: input, shape index: {}]   ;;  %s5218_s10 = inlined_call_operand.vmem [shape: f32[1,128], index: 10, kind: input, shape index: {}]   ;;  %s5219_s11 = inlined_call_operand.hbm [shape: f32[2,8,128], index: 11, kind: output, shape index: {}]  }
   0x1   :  { %5220 = sst [smem:[#allocation6_spill]] %s5209_s1 }
   0x2   :  { %16 = vsyncpa [#allocation3], 0 }
   0x3   :  { %18 = vsyncpa [#allocation3 + $0x1], 0  ;;  %s4174_s17 = smov 0   ;;  %s4176_s18 = smov 0  }
   0x4   :  { %s4178_s19 = smov 0   ;;  %s4180_s20 = smov 0  }
   0x5 LB: > { %s4195_s21 = sadd.s32 4294967295, %s4108_s20   ;;  %s2651_s22 = sadd.s32 4294967294, %s4108_s20   ;;  %s4108_s20 = sphi %s4180_s20, %s5229_s20   ;;  %s4104_s19 = sphi %s4178_s19, %s5228_s19   ;;  %s4100_s18 = sphi %s4176_s18, %s5227_s18   ;;  %s4096_s17 = sphi %s4174_s17, %s5226_s17  }
   0x6   : > { %s4199_s23 = sadd.s32 1, %s4108_s20   ;;  %s267_s24 = sadd.s32 1, %s4104_s19 }
   0x7   : > { %s264_s25 = ssub.s32 %s4108_s20, %s4199_s23  ;;  %p277_p0 = scmp.ne.s32.totalorder %s4104_s19, %s4100_s18 }
   0x8   : > { %p265_p1 = scmp.eq.s32.totalorder %s264_s25, 0  ;;  %p278_p2 = scmp.eq.s32.totalorder %s4195_s21, 1 }
   0x9   : > { %p283_p3 = scmp.ne.s32.totalorder %s4100_s18, %s4096_s17  ;;  %p284_p4 = scmp.eq.s32.totalorder %s2651_s22, 1 }
   0xa   : > { %s4210_s26 = scalar_select %p265_p1, %s4104_s19, %s267_s24  }
   0xb   : > { %p4212_p5 = por %p278_p2, %p277_p0  ;;  %p4216_p6 = por %p284_p4, %p283_p3 }
   0xc   : > { %5221 = sst [smem:[#allocation5_spill]] %s4210_s26  ;;  %p2654_p7 = scmp.ge.s32.totalorder %s4108_s20, 1 }
   0xd   : > { %p339_p8 = scmp.lt.s32.totalorder %s4108_s20, 3 }
   0xf   : > { %p340_p9 = pnand %p2654_p7, %p339_p8 }
  0x10   : > { %s5224_s1 = sld [smem:[#allocation6_spill]] (!%p340_p9)  ;;  %v4110_v3 = vmov (!%p340_p9), 0.0|0.0   ;;  %vm4111_vm0 = vmmov (!%p340_p9), 0   ;;  %v4112_v6 = vmov (!%p340_p9), 0.0   ;;  %v476_v10 = vld [vmem:[%s5211_s3] sm:$0xff] (!%p340_p9)  ;;  %v477_v11 = vld [vmem:[%s5211_s3 + $0x8] sm:$0xff] (!%p340_p9) }
  0x11   : > { %343 = sbr.rel (%p340_p9) target bundleno = 4210 (0x1072), region = 64  ;;  %3652 = vmatprep.subr.bf16.mxu0 (!%p340_p9), %v4110_v3  ;;  %3145 = vmatprep.mubr.msk.f32.mxu0 (!%p340_p9), %vm4111_vm0, %v4112_v6  ;;  %v3677_v12 = vpack.c.bf16 (!%p340_p9), %v477_v11, %v476_v10  ;;  %v478_v13 = vld [vmem:[%s5211_s3 + $0x10] sm:$0xff] (!%p340_p9)  ;;  %v479_v15 = vld [vmem:[%s5211_s3 + $0x18] sm:$0xff] (!%p340_p9)  ;;  %v480_v19 = vld [vmem:[%s5211_s3 + $0x20] sm:$0xff] (!%p340_p9)  ;;  %p378_p10 = scmp.lt.s32.totalorder (!%p340_p9), %s4195_s21, 1  ;;  %vm756_vm1 = vcmask (!%p340_p9), 261120  }
  0x12   : > { %3676 = vmatprep.subr.bf16.mxu1 (!%p340_p9), %v4110_v3  ;;  %3180 = vmatprep.mubr.msk.f32.mxu1 (!%p340_p9), %vm4111_vm0, %v4112_v6  ;;  %v3680_v18 = vpack.c.bf16 (!%p340_p9), %v479_v15, %v478_v13  ;;  %v481_v20 = vld [vmem:[%s5211_s3 + $0x28] sm:$0xff] (!%p340_p9)  ;;  %v482_v25 = vld [vmem:[%s5211_s3 + $0x30] sm:$0xff] (!%p340_p9)  ;;  %v483_v26 = vld [vmem:[%s5211_s3 + $0x38] sm:$0xff] (!%p340_p9)  ;;  %vm833_vm2 = vcmask (!%p340_p9), 64512   ;;  %s375_s30 = sand.u32 (!%p340_p9), 1, %s4100_s18   ;;  %s2853_s26 = sshll.u32 (!%p340_p9), %s4195_s21, 7 }
  0x13   : > { %3678 = vmatpush3.bf16.msra.mxu1 (!%p340_p9), %v3677_v12  ;;  %v3683_v24 = vpack.c.bf16 (!%p340_p9), %v481_v20, %v480_v19  ;;  %v3686_v30 = vpack.c.bf16 (!%p340_p9), %v483_v26, %v482_v25  ;;  %v484_v31 = vld [vmem:[%s5211_s3 + $0x40] sm:$0xff] (!%p340_p9)  ;;  %v485_v32 = vld [vmem:[%s5211_s3 + $0x48] sm:$0xff] (!%p340_p9)  ;;  %v486_v37 = vld [vmem:[%s5211_s3 + $0x50] sm:$0xff] (!%p340_p9)  ;;  %s2655_s12 = sshll.u32 (!%p340_p9), %s375_s30, 3  ;;  %s2579_s25 = scalar_lea.sflag (!%p340_p9), [#allocation3], %s375_s30 }
  0x14   : > { %3679 = vmatprep.subr.bf16.mxu1 (!%p340_p9), %v4110_v3  ;;  %v3689_v36 = vpack.c.bf16 (!%p340_p9), %v485_v32, %v484_v31  ;;  %v487_v38 = vld [vmem:[%s5211_s3 + $0x58] sm:$0xff] (!%p340_p9)  ;;  %v488_v43 = vld [vmem:[%s5211_s3 + $0x60] sm:$0xff] (!%p340_p9)  ;;  %v489_v44 = vld [vmem:[%s5211_s3 + $0x68] sm:$0xff] (!%p340_p9)  ;;  %s377_s13 = scalar_lea.vmem (!%p340_p9), [#allocation2], %s2655_s12 }
  0x15   : > { %v3692_v42 = vpack.c.bf16 (!%p340_p9), %v487_v38, %v486_v37  ;;  %v570_v46 = vld [vmem:[%s5213_s5] sm:$0xff] (!%p340_p9)  ;;  %v571_v47 = vld [vmem:[%s5213_s5 + $0x8] sm:$0xff] (!%p340_p9)  ;;  %v3695_v48 = vpack.c.bf16 (!%p340_p9), %v489_v44, %v488_v43  ;;  %v490_v49 = vld [vmem:[%s5211_s3 + $0x70] sm:$0xff] (!%p340_p9)  ;;  %s2592_s14 = sshll.u32 (!%p340_p9), %s377_s13, 4  ;;  %s5168_s14 = int_to_ptr.vmem [resolvable:$true] %s2592_s14 }
  0x16   : > { %v383_v0 = vld [vmem:[%s5224_s1] sm:$0xff] (!%p340_p9)  ;;  %v384_v1 = vld [vmem:[%s5224_s1 + $0x8] sm:$0xff] (!%p340_p9)  ;;  %v385_v2 = vld [vmem:[%s5224_s1 + $0x10] sm:$0xff] (!%p340_p9)  ;;  %v3701_v52 = vpack.c.bf16 (!%p340_p9), %v571_v47, %v570_v46  ;;  %s4046_s29 = scalar_lea.vmem (!%p340_p9), %s5168_s14, 128 }
  0x17   : > { %v3653_v4 = vpack.c.bf16 (!%p340_p9), %v384_v1, %v383_v0  ;;  %v386_v5 = vld [vmem:[%s5224_s1 + $0x18] sm:$0xff] (!%p340_p9)  ;;  %v387_v8 = vld [vmem:[%s5224_s1 + $0x20] sm:$0xff] (!%p340_p9)  ;;  %v388_v9 = vld [vmem:[%s5224_s1 + $0x28] sm:$0xff] (!%p340_p9)  ;;  %3681 = vmatpush3.bf16.msra.mxu1 (!%p340_p9), %v3680_v18  ;;  %p4047_p11 = scmp.ne.s32.totalorder (!%p340_p9), %s5168_s14, %s4046_s29 }
  0x18   : > { %v3656_v7 = vpack.c.bf16 %v386_v5, %v385_v2  ;;  %v3659_v14 = vpack.c.bf16 %v388_v9, %v387_v8  ;;  %v389_v16 = vld [vmem:[%s5224_s1 + $0x30] sm:$0xff]  ;;  %v390_v17 = vld [vmem:[%s5224_s1 + $0x38] sm:$0xff]  ;;  %v391_v22 = vld [vmem:[%s5224_s1 + $0x40] sm:$0xff]  ;;  %3682 = vmatprep.subr.bf16.mxu1 %v4110_v3  ;;  %s379_s24 = scalar_select %p378_p10, %s4195_s21, 1 }
  0x19   : > { %3654 = vmatpush3.bf16.msra.mxu0 %v3653_v4  ;;  %v3662_v21 = vpack.c.bf16 %v390_v17, %v389_v16  ;;  %v392_v23 = vld [vmem:[%s5224_s1 + $0x48] sm:$0xff]  ;;  %v393_v28 = vld [vmem:[%s5224_s1 + $0x50] sm:$0xff]  ;;  %v394_v29 = vld [vmem:[%s5224_s1 + $0x58] sm:$0xff]  ;;  %p4048_p12 = pnand %p4047_p11, %p4212_p5  ;;  %s4113_s21 = smov [#allocation2]  }
  0x1a   : > { %3655 = vmatprep.subr.bf16.mxu0 %v4110_v3  ;;  %v3665_v27 = vpack.c.bf16 %v392_v23, %v391_v22  ;;  %v3668_v33 = vpack.c.bf16 %v394_v29, %v393_v28  ;;  %v395_v34 = vld [vmem:[%s5224_s1 + $0x60] sm:$0xff]  ;;  %v396_v35 = vld [vmem:[%s5224_s1 + $0x68] sm:$0xff]  ;;  %v397_v40 = vld [vmem:[%s5224_s1 + $0x70] sm:$0xff]  ;;  %s2656_s22 = sshll.u32 %s379_s24, 3  ;;  %s5166_s24 = scalar_lea.hbm %s5219_s11, %s2853_s26 }
  0x1b   : > { %3684 = vmatpush3.bf16.msra.mxu1 %v3683_v24  ;;  %v3671_v39 = vpack.c.bf16 %v396_v35, %v395_v34  ;;  %v398_v41 = vld [vmem:[%s5224_s1 + $0x78] sm:$0xff]  ;;  %s381_s15 = scalar_lea.vmem %s5208_s0, %s2656_s22  ;;  %v572_v53 = vld [vmem:[%s5213_s5 + $0x10] sm:$0xff]  ;;  %v574_v57 = vld [vmem:[%s5213_s5 + $0x20] sm:$0xff]  ;;  %p4049_p13 = pneg %p4048_p12 }
  0x1c   : > { %3685 = vmatprep.subr.bf16.mxu1 %v4110_v3  ;;  %v3674_v45 = vpack.c.bf16 %v398_v41, %v397_v40  ;;  %v491_v50 = vld [vmem:[%s5211_s3 + $0x78] sm:$0xff]  ;;  %v382_v51 = vld [vmem:[%s381_s15] sm:$0xff]  ;;  %v575_v58 = vld [vmem:[%s5213_s5 + $0x28] sm:$0xff]  ;;  %s4050_s12 = sshll.u32 %s4113_s21, 4  ;;  %s4051_s12 = int_to_ptr.vmem [resolvable:$false] %s4050_s12 }
  0x1d   : > { %3657 = vmatpush3.bf16.msra.mxu0 %v3656_v7  ;;  %v573_v54 = vld [vmem:[%s5213_s5 + $0x18] sm:$0xff]  ;;  %v3698_v55 = vpack.c.bf16 %v491_v50, %v490_v49  ;;  %v3707_v59 = vpack.c.bf16 %v575_v58, %v574_v57  ;;  %v576_v60 = vld [vmem:[%s5213_s5 + $0x30] sm:$0xff]  ;;  %v578_v63 = vld [vmem:[%s5213_s5 + $0x40] sm:$0xff]  ;;  %s4052_s22 = scalar_lea.vmem %s4051_s12, 256  ;;  %p4053_p0 = scmp.lt.s32.totalorder %s5168_s14, %s4051_s12 }
  0x1e   : > { %3658 = vmatprep.subr.bf16.mxu0 %v4110_v3  ;;  %v3704_v56 = vpack.c.bf16 %v573_v54, %v572_v53  ;;  %v577_v61 = vld [vmem:[%s5213_s5 + $0x38] sm:$0xff]  ;;  %v579_v0 = vld [vmem:[%s5213_s5 + $0x48] sm:$0xff]  ;;  %v580_v2 = vld [vmem:[%s5213_s5 + $0x50] sm:$0xff]  ;;  %p4054_p1 = scmp.lt.s32.totalorder %s4052_s22, %s4046_s29 }
  0x1f   : > { %3687 = vmatpush3.bf16.msra.mxu1 %v3686_v30  ;;  %v3710_v62 = vpack.c.bf16 %v577_v61, %v576_v60  ;;  %v3713_v1 = vpack.c.bf16 %v579_v0, %v578_v63  ;;  %v581_v4 = vld [vmem:[%s5213_s5 + $0x58] sm:$0xff]  ;;  %v582_v7 = vld [vmem:[%s5213_s5 + $0x60] sm:$0xff]  ;;  %v583_v8 = vld [vmem:[%s5213_s5 + $0x68] sm:$0xff] }
  0x20   : > { %3688 = vmatprep.subr.bf16.mxu1 %v4110_v3  ;;  %v3716_v5 = vpack.c.bf16 %v581_v4, %v580_v2  ;;  %v3719_v9 = vpack.c.bf16 %v583_v8, %v582_v7  ;;  %v584_v10 = vld [vmem:[%s5213_s5 + $0x70] sm:$0xff]  ;;  %v585_v11 = vld [vmem:[%s5213_s5 + $0x78] sm:$0xff]  ;;  %v663_v13 = vld [vmem:[%s5215_s7] sm:$0xff]  ;;  %p4055_p2 = por %p4054_p1, %p4053_p0 }
  0x21   : > { %3660 = vmatpush3.bf16.msra.mxu0 %v3659_v14  ;;  %v3722_v12 = vpack.c.bf16 %v585_v11, %v584_v10  ;;  %v664_v14 = vld [vmem:[%s5215_s7 + $0x8] sm:$0xff]  ;;  %v2664_v15 = vld [vmem:[%s5211_s3 + $0x80] sm:$0xff]  ;;  %v666_v24 = vld [vmem:[%s5215_s7 + $0x18] sm:$0xff] }
  0x22   : > { %3661 = vmatprep.subr.bf16.mxu0 %v4110_v3  ;;  %v2665_v16 = vld [vmem:[%s5211_s3 + $0x88] sm:$0xff]  ;;  %v2657_v17 = vld [vmem:[%s5210_s2] ss:$0 sm:$0xff]  ;;  %v3725_v19 = vpack.c.bf16 %v664_v14, %v663_v13  ;;  %v2666_v25 = vld [vmem:[%s5211_s3 + $0x90] sm:$0xff]  ;;  %p4056_p3 = pnand %p4055_p2, %p4049_p13 }
  0x23   : > { %3690 = vmatpush3.bf16.msra.mxu1 %v3689_v36  ;;  %v3749_v20 = vpack.c.bf16 %v2665_v16, %v2664_v15  ;;  %v2667_v26 = vld [vmem:[%s5211_s3 + $0x98] sm:$0xff]  ;;  %v667_v29 = vld [vmem:[%s5215_s7 + $0x20] sm:$0xff]  ;;  %v668_v30 = vld [vmem:[%s5215_s7 + $0x28] sm:$0xff] }
  0x24   : > { %3691 = vmatprep.subr.bf16.mxu1 %v4110_v3  ;;  %v3752_v28 = vpack.c.bf16 %v2667_v26, %v2666_v25  ;;  %v2668_v31 = vld [vmem:[%s5211_s3 + $0xa0] sm:$0xff]  ;;  %v2669_v32 = vld [vmem:[%s5211_s3 + $0xa8] sm:$0xff]  ;;  %v669_v35 = vld [vmem:[%s5215_s7 + $0x30] sm:$0xff] }
  0x25   : > { %3663 = vmatpush3.bf16.msra.mxu0 %v3662_v21  ;;  %v665_v21 = vld [vmem:[%s5215_s7 + $0x10] sm:$0xff]  ;;  %v3755_v34 = vpack.c.bf16 %v2669_v32, %v2668_v31  ;;  %v670_v36 = vld [vmem:[%s5215_s7 + $0x38] sm:$0xff]  ;;  %v671_v41 = vld [vmem:[%s5215_s7 + $0x40] sm:$0xff] }
  0x26   : > { %3664 = vmatprep.subr.bf16.mxu0 %v4110_v3  ;;  %v2670_v37 = vld [vmem:[%s5211_s3 + $0xb0] sm:$0xff]  ;;  %v2671_v38 = vld [vmem:[%s5211_s3 + $0xb8] sm:$0xff]  ;;  %v2672_v43 = vld [vmem:[%s5211_s3 + $0xc0] sm:$0xff] }
  0x27   : > { %3693 = vmatpush3.bf16.msra.mxu1 %v3692_v42  ;;  %v3758_v40 = vpack.c.bf16 %v2671_v38, %v2670_v37  ;;  %v672_v42 = vld [vmem:[%s5215_s7 + $0x48] sm:$0xff]  ;;  %v673_v47 = vld [vmem:[%s5215_s7 + $0x50] sm:$0xff]  ;;  %v2675_v50 = vld [vmem:[%s5211_s3 + $0xd8] sm:$0xff] }
  0x28   : > { %3694 = vmatprep.subr.bf16.mxu1 %v4110_v3  ;;  %v2673_v44 = vld [vmem:[%s5211_s3 + $0xc8] sm:$0xff]  ;;  %v2674_v49 = vld [vmem:[%s5211_s3 + $0xd0] sm:$0xff]  ;;  %v675_v53 = vld [vmem:[%s5215_s7 + $0x60] sm:$0xff] }
  0x29   : > { %3666 = vmatpush3.bf16.msra.mxu0 %v3665_v27  ;;  %v3728_v27 = vpack.c.bf16 %v666_v24, %v665_v21  ;;  %v3761_v46 = vpack.c.bf16 %v2673_v44, %v2672_v43  ;;  %v676_v54 = vld [vmem:[%s5215_s7 + $0x68] sm:$0xff]  ;;  %v678_v60 = vld [vmem:[%s5215_s7 + $0x78] sm:$0xff]  ;;  %v2678_v61 = vld [vmem:[%s5211_s3 + $0xf0] sm:$0xff] }
  0x2a   : > { %3667 = vmatprep.subr.bf16.mxu0 %v4110_v3  ;;  %v3743_v57 = vpack.c.bf16 %v676_v54, %v675_v53  ;;  %v2701_v2 = vld [vmem:[%s5215_s7 + $0x88] sm:$0xff]  ;;  %v2703_v7 = vld [vmem:[%s5215_s7 + $0x98] sm:$0xff]  ;;  %v2708_v15 = vld [vmem:[%s5215_s7 + $0xc0] sm:$0xff] }
  0x2b   : > { %3696 = vmatpush3.bf16.msra.mxu1 %v3695_v48  ;;  %v674_v48 = vld [vmem:[%s5215_s7 + $0x58] sm:$0xff]  ;;  %v2705_v10 = vld [vmem:[%s5215_s7 + $0xa8] sm:$0xff]  ;;  %v2712_v21 = vld [vmem:[%s5215_s7 + $0xe0] sm:$0xff] }
  0x2c   : > { %3697 = vmatprep.subr.bf16.mxu1 %v4110_v3  ;;  %v2707_v13 = vld [vmem:[%s5215_s7 + $0xb8] sm:$0xff]  ;;  %v2709_v16 = vld [vmem:[%s5215_s7 + $0xc8] sm:$0xff]  ;;  %v2714_v25 = vld [vmem:[%s5215_s7 + $0xf0] sm:$0xff] }
  0x2d   : > { %3669 = vmatpush3.bf16.msra.mxu0 %v3668_v33  ;;  %v3731_v33 = vpack.c.bf16 %v668_v30, %v667_v29  ;;  %v2715_v26 = vld [vmem:[%s5215_s7 + $0xf8] sm:$0xff]  ;;  %v2746_v29 = vld [vmem:[%s5213_s5 + $0x108] sm:$0xff]  ;;  %v2747_v31 = vld [vmem:[%s5213_s5 + $0x110] sm:$0xff] }
  0x2e   : > { %3670 = vmatprep.subr.bf16.mxu0 %v4110_v3  ;;  %v2748_v32 = vld [vmem:[%s5213_s5 + $0x118] sm:$0xff]  ;;  %v2751_v37 = vld [vmem:[%s5213_s5 + $0x130] sm:$0xff]  ;;  %v2659_v53 = vld [vmem:[%s5214_s6] ss:$0 sm:$0xff] }
  0x2f   : > { %3699 = vmatpush3.bf16.msra.mxu1 %v3698_v55  ;;  %v2676_v55 = vld [vmem:[%s5211_s3 + $0xe0] sm:$0xff]  ;;  %v2752_v38 = vld [vmem:[%s5213_s5 + $0x138] sm:$0xff]  ;;  %v2755_v43 = vld [vmem:[%s5213_s5 + $0x150] sm:$0xff] }
  0x30   : > { %3724 = vmatprep.subr.bf16.mxu1 %v4110_v3  ;;  %v2756_v44 = vld [vmem:[%s5213_s5 + $0x158] sm:$0xff] }
  0x31   : > { %3672 = vmatpush3.bf16.msra.mxu0 %v3671_v39  ;;  %v3734_v39 = vpack.c.bf16 %v670_v36, %v669_v35  ;;  %v2750_v35 = vld [vmem:[%s5213_s5 + $0x128] sm:$0xff] }
  0x32   : > { %3673 = vmatprep.subr.bf16.mxu0 %v4110_v3 }
  0x35   : > { %3675 = vmatpush3.bf16.msra.mxu0 %v3674_v45  ;;  %v3737_v45 = vpack.c.bf16 %v672_v42, %v671_v41  ;;  %v2754_v41 = vld [vmem:[%s5213_s5 + $0x148] sm:$0xff] }
  0x36   : > { %3700 = vmatprep.subr.bf16.mxu0 %v4110_v3 }
  0x38   : > { %3146 = vmatmul.mubr.f32.vlgmr.msra.gmra.mrb[0].mxu0 %v382_v51  ;;  %v3740_v51 = vpack.c.bf16 %v674_v48, %v673_v47  ;;  %v2758_v47 = vld [vmem:[%s5213_s5 + $0x168] sm:$0xff] }
  0x39   : > { %3702 = vmatpush3.bf16.msra.mxu0 %v3701_v52  ;;  %3215 = vmatprep.mubr.msk.f32.mxu0 %vm4111_vm0, %v4112_v6  ;;  %v3764_v52 = vpack.c.bf16 %v2675_v50, %v2674_v49  ;;  %v2759_v49 = vld [vmem:[%s5213_s5 + $0x170] sm:$0xff]  ;;  %v2760_v50 = vld [vmem:[%s5213_s5 + $0x178] sm:$0xff] }
  0x3a   : > { %3703 = vmatprep.subr.bf16.mxu0 %v4110_v3 }
  0x3d   : > { %3705 = vmatpush3.bf16.msra.mxu0 %v3704_v56  ;;  %v2677_v56 = vld [vmem:[%s5211_s3 + $0xe8] sm:$0xff] }
  0x3e   : > { %3706 = vmatprep.subr.bf16.mxu0 %v4110_v3  ;;  %v3767_v58 = vpack.c.bf16 %v2677_v56, %v2676_v55 }
  0x41   : > { %3708 = vmatpush3.bf16.msra.mxu0 %v3707_v59  ;;  %v677_v59 = vld [vmem:[%s5215_s7 + $0x70] sm:$0xff] }
  0x42   : > { %3709 = vmatprep.subr.bf16.mxu0 %v4110_v3  ;;  %v3746_v63 = vpack.c.bf16 %v678_v60, %v677_v59 }
  0x45   : > { %3711 = vmatpush3.bf16.msra.mxu0 %v3710_v62  ;;  %v2679_v62 = vld [vmem:[%s5211_s3 + $0xf8] sm:$0xff] }
  0x46   : > { %3712 = vmatprep.subr.bf16.mxu0 %v4110_v3  ;;  %v3770_v0 = vpack.c.bf16 %v2679_v62, %v2678_v61  ;;  %v2660_v61 = vld [vmem:[%s5216_s8] ss:$0 sm:$0xff] }
  0x49   : > { %3714 = vmatpush3.bf16.msra.mxu0 %v3713_v1  ;;  %v2700_v1 = vld [vmem:[%s5215_s7 + $0x80] sm:$0xff] }
  0x4a   : > { %3715 = vmatprep.subr.bf16.mxu0 %v4110_v3  ;;  %v3797_v4 = vpack.c.bf16 %v2701_v2, %v2700_v1 }
  0x4d   : > { %3717 = vmatpush3.bf16.msra.mxu0 %v3716_v5  ;;  %v2702_v5 = vld [vmem:[%s5215_s7 + $0x90] sm:$0xff] }
  0x4e   : > { %3718 = vmatprep.subr.bf16.mxu0 %v4110_v3  ;;  %v3800_v8 = vpack.c.bf16 %v2703_v7, %v2702_v5  ;;  %v2762_v7 = vld [vmem:[%s5214_s6 + $0x2] ss:$0 sm:$0xff] }
  0x51   : > { %3720 = vmatpush3.bf16.msra.mxu0 %v3719_v9  ;;  %v2704_v9 = vld [vmem:[%s5215_s7 + $0xa0] sm:$0xff] }
  0x52   : > { %3721 = vmatprep.subr.bf16.mxu0 %v4110_v3  ;;  %v3803_v11 = vpack.c.bf16 %v2705_v10, %v2704_v9 }
  0x55   : > { %3723 = vmatpush3.bf16.msra.mxu0 %v3722_v12  ;;  %v2706_v12 = vld [vmem:[%s5215_s7 + $0xb0] sm:$0xff] }
  0x56   : > { %3748 = vmatprep.subr.bf16.mxu0 %v4110_v3  ;;  %v3806_v14 = vpack.c.bf16 %v2707_v13, %v2706_v12 }
 0x10b   : > { %v472_v18 = vpop.f32.mrb[0].mxu0 }
 0x10c   : > { %v4421_v22 = vadd.f32 %v2657_v17, %v472_v18  ;;  %v3147_v23 = vpop.f32.mrb[1].mxu0  ;;  %v3809_v17 = vpack.c.bf16 %v2709_v16, %v2708_v15  ;;  %v2710_v18 = vld [vmem:[%s5215_s7 + $0xd0] sm:$0xff] }
 0x10d   : > { %v2713_v23 = vld [vmem:[%s5215_s7 + $0xe8] sm:$0xff] }
 0x10e   : > { %3181 = vmatmul.mubr.f32.vlgmr.msra.gmra.mrb[0].mxu1 %v4421_v22  ;;  %3216 = vmatmul.mubr.f32.vlgmr.msra.gmra.mrb[2].mxu0 %v4421_v22  ;;  %v3815_v24 = vpack.c.bf16 %v2713_v23, %v2712_v21  ;;  %v2683_v21 = vld [vmem:[%s5213_s5 + $0x88] sm:$0xff] }
 0x10f   : > { %3726 = vmatpush3.bf16.msra.mxu1 %v3725_v19  ;;  %3750 = vmatpush3.bf16.msra.mxu0 %v3749_v20  ;;  %v2711_v19 = vld [vmem:[%s5215_s7 + $0xd8] sm:$0xff] }
 0x110   : > { %3727 = vmatprep.subr.bf16.mxu1 %v4110_v3  ;;  %3751 = vmatprep.subr.bf16.mxu0 %v4110_v3  ;;  %v3812_v20 = vpack.c.bf16 %v2711_v19, %v2710_v18 }
 0x111   : > { %3250 = vmatprep.mubr.msk.f32.mxu1 %vm4111_vm0, %v4112_v6  ;;  %3295 = vmatprep.mubr.msk.f32.mxu0 %vm4111_vm0, %v4112_v6 }
 0x113   : > { %3729 = vmatpush3.bf16.msra.mxu1 %v3728_v27  ;;  %3753 = vmatpush3.bf16.msra.mxu0 %v3752_v28  ;;  %v3818_v27 = vpack.c.bf16 %v2715_v26, %v2714_v25  ;;  %v2745_v28 = vld [vmem:[%s5213_s5 + $0x100] sm:$0xff]  ;;  %v2684_v26 = vld [vmem:[%s5213_s5 + $0x90] sm:$0xff] }
 0x114   : > { %3730 = vmatprep.subr.bf16.mxu1 %v4110_v3  ;;  %3754 = vmatprep.subr.bf16.mxu0 %v4110_v3  ;;  %v3857_v30 = vpack.c.bf16 %v2746_v29, %v2745_v28  ;;  %v2686_v29 = vld [vmem:[%s5213_s5 + $0xa0] sm:$0xff] }
 0x117   : > { %3732 = vmatpush3.bf16.msra.mxu1 %v3731_v33  ;;  %3756 = vmatpush3.bf16.msra.mxu0 %v3755_v34  ;;  %v3860_v33 = vpack.c.bf16 %v2748_v32, %v2747_v31  ;;  %v2749_v34 = vld [vmem:[%s5213_s5 + $0x120] sm:$0xff]  ;;  %v2688_v32 = vld [vmem:[%s5213_s5 + $0xb0] sm:$0xff] }
 0x118   : > { %3733 = vmatprep.subr.bf16.mxu1 %v4110_v3  ;;  %3757 = vmatprep.subr.bf16.mxu0 %v4110_v3  ;;  %v3863_v36 = vpack.c.bf16 %v2750_v35, %v2749_v34  ;;  %v2690_v35 = vld [vmem:[%s5213_s5 + $0xc0] sm:$0xff] }
 0x11b   : > { %3735 = vmatpush3.bf16.msra.mxu1 %v3734_v39  ;;  %3759 = vmatpush3.bf16.msra.mxu0 %v3758_v40  ;;  %v3866_v39 = vpack.c.bf16 %v2752_v38, %v2751_v37  ;;  %v2753_v40 = vld [vmem:[%s5213_s5 + $0x140] sm:$0xff]  ;;  %v2692_v38 = vld [vmem:[%s5213_s5 + $0xd0] sm:$0xff] }
 0x11c   : > { %3736 = vmatprep.subr.bf16.mxu1 %v4110_v3  ;;  %3760 = vmatprep.subr.bf16.mxu0 %v4110_v3  ;;  %v3869_v42 = vpack.c.bf16 %v2754_v41, %v2753_v40  ;;  %v2694_v41 = vld [vmem:[%s5213_s5 + $0xe0] sm:$0xff] }
 0x11f   : > { %3738 = vmatpush3.bf16.msra.mxu1 %v3737_v45  ;;  %3762 = vmatpush3.bf16.msra.mxu0 %v3761_v46  ;;  %v3872_v45 = vpack.c.bf16 %v2756_v44, %v2755_v43  ;;  %v2757_v46 = vld [vmem:[%s5213_s5 + $0x160] sm:$0xff]  ;;  %v2696_v44 = vld [vmem:[%s5213_s5 + $0xf0] sm:$0xff] }
 0x120   : > { %3739 = vmatprep.subr.bf16.mxu1 %v4110_v3  ;;  %3763 = vmatprep.subr.bf16.mxu0 %v4110_v3  ;;  %v3875_v48 = vpack.c.bf16 %v2758_v47, %v2757_v46 }
 0x123   : > { %3741 = vmatpush3.bf16.msra.mxu1 %v3740_v51  ;;  %3765 = vmatpush3.bf16.msra.mxu0 %v3764_v52  ;;  %v3878_v51 = vpack.c.bf16 %v2760_v50, %v2759_v49  ;;  %v2658_v52 = vld [vmem:[%s5212_s4] ss:$0 sm:$0xff]  ;;  %v2681_v49 = vld [vmem:[%s5212_s4 + $0x1] ss:$0 sm:$0xff] }
 0x124   : > { %3742 = vmatprep.subr.bf16.mxu1 %v4110_v3  ;;  %3766 = vmatprep.subr.bf16.mxu0 %v4110_v3  ;;  %v2699_v50 = vld [vmem:[%s5214_s6 + $0x1] ss:$0 sm:$0xff] }
 0x127   : > { %3744 = vmatpush3.bf16.msra.mxu1 %v3743_v57  ;;  %3768 = vmatpush3.bf16.msra.mxu0 %v3767_v58 }
 0x128   : > { %3745 = vmatprep.subr.bf16.mxu1 %v4110_v3  ;;  %3769 = vmatprep.subr.bf16.mxu0 %v4110_v3 }
 0x12b   : > { %3747 = vmatpush3.bf16.msra.mxu1 %v3746_v63  ;;  %3771 = vmatpush3.bf16.msra.mxu0 %v3770_v0 }
 0x12c   : > { %3796 = vmatprep.subr.bf16.mxu0 %v4110_v3  ;;  %3253 = vmatprep.subr.mxu1 %v4112_v6 }
 0x12e   : > { %3251 = vmatmul.mubr.f32.vlgmr.msra.gmra.mrb[2].mxu1 %v4421_v22  ;;  %3296 = vmatmul.mubr.f32.vlgmr.msra.gmra.mrb[4].mxu0 %v4421_v22 }
 0x12f   : > { %3798 = vmatpush3.bf16.msra.mxu0 %v3797_v4  ;;  %3365 = vmatprep.mubr.msk.f32.mxu0 %vm4111_vm0, %v4112_v6 }
 0x130   : > { %3799 = vmatprep.subr.bf16.mxu0 %v4110_v3  ;;  %3255 = vmatprep.mubr.msk.f32.mxu1 %vm4111_vm0, %v4112_v6 }
 0x133   : > { %3801 = vmatpush3.bf16.msra.mxu0 %v3800_v8 }
 0x134   : > { %3802 = vmatprep.subr.bf16.mxu0 %v4110_v3 }
 0x137   : > { %3804 = vmatpush3.bf16.msra.mxu0 %v3803_v11 }
 0x138   : > { %3805 = vmatprep.subr.bf16.mxu0 %v4110_v3 }
 0x13b   : > { %3807 = vmatpush3.bf16.msra.mxu0 %v3806_v14 }
 0x13c   : > { %3808 = vmatprep.subr.bf16.mxu0 %v4110_v3 }
 0x13f   : > { %3810 = vmatpush3.bf16.msra.mxu0 %v3809_v17 }
 0x140   : > { %3811 = vmatprep.subr.bf16.mxu0 %v4110_v3 }
 0x143   : > { %3813 = vmatpush3.bf16.msra.mxu0 %v3812_v20  ;;  %v2682_v20 = vld [vmem:[%s5213_s5 + $0x80] sm:$0xff] }
 0x144   : > { %3814 = vmatprep.subr.bf16.mxu0 %v4110_v3 }
 0x147   : > { %3816 = vmatpush3.bf16.msra.mxu0 %v3815_v24  ;;  %v3773_v24 = vpack.c.bf16 %v2683_v21, %v2682_v20  ;;  %v2727_v21 = vld [vmem:[%s5211_s3 + $0x100] sm:$0xff] }
 0x148   : > { %3817 = vmatprep.subr.bf16.mxu0 %v4110_v3 }
 0x14b   : > { %3819 = vmatpush3.bf16.msra.mxu0 %v3818_v27  ;;  %v2685_v27 = vld [vmem:[%s5213_s5 + $0x98] sm:$0xff] }
 0x14c   : > { %3856 = vmatprep.subr.bf16.mxu0 %v4110_v3  ;;  %v3776_v28 = vpack.c.bf16 %v2685_v27, %v2684_v26  ;;  %v2730_v26 = vld [vmem:[%s5211_s3 + $0x118] sm:$0xff] }
 0x14e   : > { %3366 = vmatmul.mubr.f32.vlgmr.msra.gmra.mrb[6].mxu0 %v4421_v22 }
 0x14f   : > { %3858 = vmatpush3.bf16.msra.mxu0 %v3857_v30  ;;  %3467 = vmatprep.mubr.msk.f32.mxu0 %vm4111_vm0, %v4112_v6  ;;  %v2687_v30 = vld [vmem:[%s5213_s5 + $0xa8] sm:$0xff] }
 0x150   : > { %3859 = vmatprep.subr.bf16.mxu0 %v4110_v3  ;;  %v3779_v31 = vpack.c.bf16 %v2687_v30, %v2686_v29  ;;  %v2732_v29 = vld [vmem:[%s5211_s3 + $0x128] sm:$0xff] }
 0x153   : > { %3861 = vmatpush3.bf16.msra.mxu0 %v3860_v33  ;;  %v2689_v33 = vld [vmem:[%s5213_s5 + $0xb8] sm:$0xff] }
 0x154   : > { %3862 = vmatprep.subr.bf16.mxu0 %v4110_v3  ;;  %v3782_v34 = vpack.c.bf16 %v2689_v33, %v2688_v32  ;;  %v2734_v32 = vld [vmem:[%s5211_s3 + $0x138] sm:$0xff] }
 0x157   : > { %3864 = vmatpush3.bf16.msra.mxu0 %v3863_v36  ;;  %v2691_v36 = vld [vmem:[%s5213_s5 + $0xc8] sm:$0xff] }
 0x158   : > { %3865 = vmatprep.subr.bf16.mxu0 %v4110_v3  ;;  %v3785_v37 = vpack.c.bf16 %v2691_v36, %v2690_v35  ;;  %v2736_v35 = vld [vmem:[%s5211_s3 + $0x148] sm:$0xff] }
 0x15b   : > { %3867 = vmatpush3.bf16.msra.mxu0 %v3866_v39  ;;  %v2693_v39 = vld [vmem:[%s5213_s5 + $0xd8] sm:$0xff] }
 0x15c   : > { %3868 = vmatprep.subr.bf16.mxu0 %v4110_v3  ;;  %v3788_v40 = vpack.c.bf16 %v2693_v39, %v2692_v38  ;;  %v2738_v38 = vld [vmem:[%s5211_s3 + $0x158] sm:$0xff] }
 0x15f   : > { %3870 = vmatpush3.bf16.msra.mxu0 %v3869_v42  ;;  %v2695_v42 = vld [vmem:[%s5213_s5 + $0xe8] sm:$0xff] }
 0x160   : > { %3871 = vmatprep.subr.bf16.mxu0 %v4110_v3  ;;  %v3791_v43 = vpack.c.bf16 %v2695_v42, %v2694_v41  ;;  %v2740_v41 = vld [vmem:[%s5211_s3 + $0x168] sm:$0xff] }
 0x163   : > { %3873 = vmatpush3.bf16.msra.mxu0 %v3872_v45  ;;  %v2697_v45 = vld [vmem:[%s5213_s5 + $0xf8] sm:$0xff] }
 0x164   : > { %3874 = vmatprep.subr.bf16.mxu0 %v4110_v3  ;;  %v3794_v46 = vpack.c.bf16 %v2697_v45, %v2696_v44  ;;  %v2742_v44 = vld [vmem:[%s5211_s3 + $0x178] sm:$0xff] }
 0x167   : > { %3876 = vmatpush3.bf16.msra.mxu0 %v3875_v48 }
 0x168   : > { %3877 = vmatprep.subr.bf16.mxu0 %v4110_v3 }
 0x16b   : > { %3879 = vmatpush3.bf16.msra.mxu0 %v3878_v51 }
 0x16c   : > { %3505 = vmatprep.subr.mxu0 %v4112_v6 }
 0x16e   : > { %3468 = vmatmul.mubr.f32.vlgmr.msra.gmra.mrb[8].mxu0 %v4421_v22 }
 0x16f   : > { %3507 = vmatprep.mubr.msk.f32.mxu0 %vm4111_vm0, %v4112_v6 }
 0x1e1   : > { %v565_v54 = vpop.f32.mrb[0].mxu1  ;;  %v659_v55 = vpop.f32.mrb[2].mxu0 }
 0x1e2   : > { %v566_v56 = vadd.f32 %v2658_v52, %v565_v54  ;;  %v660_v57 = vadd.f32 %v2659_v53, %v659_v55  ;;  %v3182_v58 = vpop.f32.mrb[1].mxu1  ;;  %v3217_v59 = vpop.f32.mrb[3].mxu0  ;;  %v2717_v55 = vld [vmem:[%s5216_s8 + $0x1] ss:$0 sm:$0xff] }
 0x1e4   : > { %v569_v60 = vmul.f32 0.17677669, %v566_v56  ;;  %3254 = vmatpush3.xpose.msk.msra.mxu1 %vm756_vm1, %v660_v57 }
 0x1e5   : > { %3258 = vmatprep.subr.mxu1 %v4112_v6 }
 0x1e7   : > { %3256 = vmatmul.mubr.msk.f32.vlgmr.msra.gmra.mrb[4].mxu1 %vm756_vm1, %v569_v60 }
 0x1e8   : > { %3260 = vmatprep.mubr.msk.f32.mxu1 %vm4111_vm0, %v4112_v6 }
 0x201   : > { %v752_v62 = vpop.f32.mrb[2].mxu1  ;;  %v4664_v63 = vpop.f32.mrb[4].mxu0 }
 0x202   : > { %v753_v0 = vadd.f32 %v2660_v61, %v752_v62  ;;  %v3252_v1 = vpop.f32.mrb[3].mxu1  ;;  %v3297_v2 = vpop.f32.mrb[5].mxu0  ;;  %v1014_v51 = vadd.f32 %v2681_v49, %v4664_v63  ;;  %v2765_v49 = vld [vmem:[%s5215_s7 + $0x110] sm:$0xff] }
 0x204   : > { %3259 = vmatpush3.msra.mxu1 %v753_v0  ;;  %v1017_v56 = vmul.f32 0.17677669, %v1014_v51 }
 0x205   : > { %3772 = vmatprep.subr.bf16.mxu1 %v4110_v3 }
 0x221   : > { %v4667_v4 = vpop.f32.mrb[6].mxu0 }
 0x222   : > { %v3367_v5 = vpop.f32.mrb[7].mxu0  ;;  %v1205_v57 = vadd.f32 %v2717_v55, %v4667_v4  ;;  %v2721_v4 = vld [vmem:[%s5217_s9 + $0x20] sm:$0xff]  ;;  %v2769_v55 = vld [vmem:[%s5215_s7 + $0x130] sm:$0xff] }
 0x223   : > { %v2722_v5 = vld [vmem:[%s5217_s9 + $0x28] sm:$0xff] }
 0x241   : > { %v1706_v8 = vpop.f32.mrb[8].mxu0 }
 0x242   : > { %v1707_v9 = vadd.f32 %v2762_v7, %v1706_v8  ;;  %v3469_v10 = vpop.f32.mrb[9].mxu0  ;;  %v3821_v8 = vpack.c.bf16 %v2722_v5, %v2721_v4  ;;  %v2777_v4 = vld [vmem:[%s5215_s7 + $0x170] sm:$0xff]  ;;  %v2778_v5 = vld [vmem:[%s5215_s7 + $0x178] sm:$0xff] }
 0x243   : > { %v2723_v10 = vld [vmem:[%s5217_s9 + $0x30] sm:$0xff] }
 0x244   : > { %3506 = vmatpush3.xpose.msk.msra.mxu0 %vm756_vm1, %v1707_v9 }
 0x245   : > { %3510 = vmatprep.subr.mxu0 %v4112_v6 }
 0x2ba   : > { %v829_v11 = vpop.f32.mrb[4].mxu1 }
 0x2bb   : > { %v3257_v12 = vpop.f32.mrb[5].mxu1  ;;  %v834_v13 = vsel %vm833_vm2, %v829_v11, -inf }
 0x2bc   : > { %835 = vmax.xlane.f32.xlu0 %v834_v13  ;;  %v918_v13 = vld [vmem:[%s5217_s9] sm:$0xff] }
 0x349   : > { %v836_v14 = vpop.xlane.xlu0 %835 }
 0x34a   : > { %v837_v15 = vsub.f32 %v829_v11, %v836_v14  ;;  %v2724_v11 = vld [vmem:[%s5217_s9 + $0x38] sm:$0xff]  ;;  %v919_v14 = vld [vmem:[%s5217_s9 + $0x8] sm:$0xff] }
 0x34b   : > { %v3824_v12 = vpack.c.bf16 %v2724_v11, %v2723_v10  ;;  %v2809_v11 = vld [vmem:[%s5213_s5 + $0x190] sm:$0xff] }
 0x34c   : > { %v838_v16 = vmul.f32 1.442695, %v837_v15  ;;  %v3827_v15 = vpack.c.bf16 %v919_v14, %v918_v13  ;;  %v2811_v14 = vld [vmem:[%s5213_s5 + $0x1a0] sm:$0xff] }
 0x34e   : > { %4030 = vpow2.f32 %v838_v16  ;;  %v920_v16 = vld [vmem:[%s5217_s9 + $0x10] sm:$0xff] }
 0x358   : > { %v4031_v17 = vpop.eup %4030 }
 0x359   : > { %v840_v18 = vsel %vm833_vm2, %v4031_v17, 0.0 }
 0x35a   : > { %841 = vadd.xlane.f32.xlu0 %v840_v18 }
 0x3e7   : > { %v842_v19 = vpop.xlane.xlu0 %841 }
 0x3e8   : > { %4032 = vrcp.f32 %v842_v19 }
 0x3f2   : > { %v4033_v23 = vpop.eup %4032 }
 0x3f3   : > { %v844_v25 = vmul.f32 %v4033_v23, %v4031_v17  ;;  %v921_v17 = vld [vmem:[%s5217_s9 + $0x18] sm:$0xff]  ;;  %v2728_v23 = vld [vmem:[%s5211_s3 + $0x108] sm:$0xff] }
 0x3f4   : > { %v3830_v20 = vpack.c.bf16 %v921_v17, %v920_v16  ;;  %v2813_v17 = vld [vmem:[%s5213_s5 + $0x1b0] sm:$0xff] }
 0x3f5   : > { %3261 = vmatmul.mubr.msk.f32.vlgmr.msra.gmra.mrb[6].mxu1 %vm833_vm2, %v844_v25  ;;  %v2729_v25 = vld [vmem:[%s5211_s3 + $0x110] sm:$0xff] }
 0x3f6   : > { %3774 = vmatpush3.bf16.msra.mxu1 %v3773_v24  ;;  %3330 = vmatprep.mubr.msk.f32.mxu1 %vm4111_vm0, %v4112_v6  ;;  %v3833_v24 = vpack.c.bf16 %v2728_v23, %v2727_v21  ;;  %v3836_v27 = vpack.c.bf16 %v2730_v26, %v2729_v25  ;;  %v2816_v21 = vld [vmem:[%s5213_s5 + $0x1c8] sm:$0xff]  ;;  %v2818_v25 = vld [vmem:[%s5213_s5 + $0x1d8] sm:$0xff] }
 0x3f7   : > { %3775 = vmatprep.subr.bf16.mxu1 %v4110_v3 }
 0x3fa   : > { %3777 = vmatpush3.bf16.msra.mxu1 %v3776_v28  ;;  %v2731_v28 = vld [vmem:[%s5211_s3 + $0x120] sm:$0xff] }
 0x3fb   : > { %3778 = vmatprep.subr.bf16.mxu1 %v4110_v3  ;;  %v3839_v30 = vpack.c.bf16 %v2732_v29, %v2731_v28  ;;  %v2820_v28 = vld [vmem:[%s5213_s5 + $0x1e8] sm:$0xff] }
 0x3fe   : > { %3780 = vmatpush3.bf16.msra.mxu1 %v3779_v31  ;;  %v2733_v31 = vld [vmem:[%s5211_s3 + $0x130] sm:$0xff] }
 0x3ff   : > { %3781 = vmatprep.subr.bf16.mxu1 %v4110_v3  ;;  %v3842_v33 = vpack.c.bf16 %v2734_v32, %v2733_v31  ;;  %v2822_v31 = vld [vmem:[%s5213_s5 + $0x1f8] sm:$0xff] }
 0x402   : > { %3783 = vmatpush3.bf16.msra.mxu1 %v3782_v34  ;;  %v2735_v34 = vld [vmem:[%s5211_s3 + $0x140] sm:$0xff] }
 0x403   : > { %3784 = vmatprep.subr.bf16.mxu1 %v4110_v3  ;;  %v3845_v36 = vpack.c.bf16 %v2736_v35, %v2735_v34 }
 0x406   : > { %3786 = vmatpush3.bf16.msra.mxu1 %v3785_v37  ;;  %v2737_v37 = vld [vmem:[%s5211_s3 + $0x150] sm:$0xff] }
 0x407   : > { %3787 = vmatprep.subr.bf16.mxu1 %v4110_v3  ;;  %v3848_v39 = vpack.c.bf16 %v2738_v38, %v2737_v37  ;;  %v2744_v38 = vld [vmem:[%s5212_s4 + $0x2] ss:$0 sm:$0xff] }
 0x40a   : > { %3789 = vmatpush3.bf16.msra.mxu1 %v3788_v40  ;;  %v2739_v40 = vld [vmem:[%s5211_s3 + $0x160] sm:$0xff] }
 0x40b   : > { %3790 = vmatprep.subr.bf16.mxu1 %v4110_v3  ;;  %v3851_v42 = vpack.c.bf16 %v2740_v41, %v2739_v40 }
 0x40e   : > { %3792 = vmatpush3.bf16.msra.mxu1 %v3791_v43  ;;  %v2741_v43 = vld [vmem:[%s5211_s3 + $0x170] sm:$0xff] }
 0x40f   : > { %3793 = vmatprep.subr.bf16.mxu1 %v4110_v3  ;;  %v3854_v45 = vpack.c.bf16 %v2742_v44, %v2741_v43  ;;  %v2780_v43 = vld [vmem:[%s5216_s8 + $0x2] ss:$0 sm:$0xff] }
 0x412   : > { %3795 = vmatpush3.bf16.msra.mxu1 %v3794_v46  ;;  %v2763_v46 = vld [vmem:[%s5215_s7 + $0x100] sm:$0xff] }
 0x413   : > { %3368 = vmatprep.subr.mxu1 %v4112_v6 }
 0x415   : > { %3331 = vmatmul.mubr.f32.vlgmr.msra.gmra.mrb[8].mxu1 %v4421_v22 }
 0x416   : > { %3370 = vmatprep.mubr.msk.f32.mxu1 %vm4111_vm0, %v4112_v6 }
 0x4c8   : > { %v4738_v47 = vpop.f32.mrb[6].mxu1 }
 0x4c9   : > { %v3262_v48 = vpop.f32.mrb[7].mxu1 }
 0x4e8   : > { %v1109_v52 = vpop.f32.mrb[8].mxu1 }
 0x4e9   : > { %v1110_v53 = vadd.f32 %v2699_v50, %v1109_v52  ;;  %v3332_v54 = vpop.f32.mrb[9].mxu1  ;;  %v2766_v50 = vld [vmem:[%s5215_s7 + $0x118] sm:$0xff]  ;;  %v2767_v52 = vld [vmem:[%s5215_s7 + $0x120] sm:$0xff] }
 0x4ea   : > { %v3884_v51 = vpack.c.bf16 %v2766_v50, %v2765_v49 }
 0x4eb   : > { %3369 = vmatpush3.xpose.msk.msra.mxu1 %vm756_vm1, %v1110_v53  ;;  %v2768_v53 = vld [vmem:[%s5215_s7 + $0x128] sm:$0xff] }
 0x4ec   : > { %3373 = vmatprep.subr.mxu1 %v4112_v6  ;;  %v3887_v54 = vpack.c.bf16 %v2768_v53, %v2767_v52 }
 0x4ee   : > { %3371 = vmatmul.mubr.msk.f32.vlgmr.msra.gmra.mrb[10].mxu1 %vm756_vm1, %v1017_v56  ;;  %v2770_v56 = vld [vmem:[%s5215_s7 + $0x138] sm:$0xff] }
 0x4ef   : > { %3374 = vmatpush3.msra.mxu1 %v1205_v57  ;;  %3375 = vmatprep.mubr.msk.f32.mxu1 %vm4111_vm0, %v4112_v6  ;;  %v3890_v57 = vpack.c.bf16 %v2770_v56, %v2769_v55 }
 0x4f0   : > { %3820 = vmatprep.subr.bf16.mxu1 %v4110_v3 }
 0x5c1   : > { %v1280_v58 = vpop.f32.mrb[10].mxu1 }
 0x5c2   : > { %v3372_v59 = vpop.f32.mrb[11].mxu1  ;;  %v1284_v60 = vsel %vm833_vm2, %v1280_v58, -inf }
 0x5c3   : > { %1285 = vmax.xlane.f32.xlu1 %v1284_v60  ;;  %v2772_v59 = vld [vmem:[%s5215_s7 + $0x148] sm:$0xff] }
 0x650   : > { %v1286_v61 = vpop.xlane.xlu1 %1285 }
 0x651   : > { %v1287_v62 = vsub.f32 %v1280_v58, %v1286_v61  ;;  %v2771_v58 = vld [vmem:[%s5215_s7 + $0x140] sm:$0xff]  ;;  %v2773_v61 = vld [vmem:[%s5215_s7 + $0x150] sm:$0xff] }
 0x652   : > { %v3893_v60 = vpack.c.bf16 %v2772_v59, %v2771_v58 }
 0x653   : > { %v1288_v63 = vmul.f32 1.442695, %v1287_v62  ;;  %v2774_v62 = vld [vmem:[%s5215_s7 + $0x158] sm:$0xff] }
 0x655   : > { %4034 = vpow2.f32 %v1288_v63  ;;  %v3896_v63 = vpack.c.bf16 %v2774_v62, %v2773_v61  ;;  %v2785_v61 = vld [vmem:[%s5217_s9 + $0x48] sm:$0xff] }
 0x65f   : > { %v4035_v0 = vpop.eup %4034 }
 0x660   : > { %v1290_v1 = vsel %vm833_vm2, %v4035_v0, 0.0 }
 0x661   : > { %1291 = vadd.xlane.f32.xlu1 %v1290_v1  ;;  %v2776_v1 = vld [vmem:[%s5215_s7 + $0x168] sm:$0xff] }
 0x6ee   : > { %v1292_v2 = vpop.xlane.xlu1 %1291 }
 0x6ef   : > { %4036 = vrcp.f32 %v1292_v2 }
 0x6f9   : > { %v4037_v7 = vpop.eup %4036 }
 0x6fa   : > { %v1294_v9 = vmul.f32 %v4037_v7, %v4035_v0  ;;  %v2775_v0 = vld [vmem:[%s5215_s7 + $0x160] sm:$0xff]  ;;  %v3902_v7 = vpack.c.bf16 %v2778_v5, %v2777_v4 }
 0x6fb   : > { %v3899_v2 = vpack.c.bf16 %v2776_v1, %v2775_v0  ;;  %v2786_v1 = vld [vmem:[%s5217_s9 + $0x50] sm:$0xff]  ;;  %v2789_v5 = vld [vmem:[%s5211_s3 + $0x180] sm:$0xff] }
 0x6fc   : > { %3376 = vmatmul.mubr.msk.f32.vlgmr.msra.gmra.mrb[12].mxu1 %vm833_vm2, %v1294_v9  ;;  %v2808_v9 = vld [vmem:[%s5213_s5 + $0x188] sm:$0xff] }
 0x6fd   : > { %3822 = vmatpush3.bf16.msra.mxu1 %v3821_v8  ;;  %3386 = vmatprep.mubr.msk.f32.mxu1 %vm4111_vm0, %v4112_v6  ;;  %v2807_v8 = vld [vmem:[%s5213_s5 + $0x180] sm:$0xff] }
 0x6fe   : > { %3823 = vmatprep.subr.bf16.mxu1 %v4110_v3  ;;  %v3935_v10 = vpack.c.bf16 %v2808_v9, %v2807_v8  ;;  %v2791_v9 = vld [vmem:[%s5211_s3 + $0x190] sm:$0xff] }
 0x701   : > { %3825 = vmatpush3.bf16.msra.mxu1 %v3824_v12  ;;  %v2810_v12 = vld [vmem:[%s5213_s5 + $0x198] sm:$0xff] }
 0x702   : > { %3826 = vmatprep.subr.bf16.mxu1 %v4110_v3  ;;  %v3938_v13 = vpack.c.bf16 %v2810_v12, %v2809_v11 }
 0x7cf   : > { %v1364_v18 = vpop.f32.mrb[12].mxu1 }
 0x7d0   : > { %v3377_v19 = vpop.f32.mrb[13].mxu1  ;;  %3387 = vmatmul.mubr.msk.f32.vlgmr.msra.gmra.mrb[14].mxu1 %vm756_vm1, %v1364_v18  ;;  %v2814_v18 = vld [vmem:[%s5213_s5 + $0x1b8] sm:$0xff] }
 0x7d1   : > { %3828 = vmatpush3.bf16.msra.mxu1 %v3827_v15  ;;  %3397 = vmatprep.mubr.msk.f32.mxu1 %vm4111_vm0, %v4112_v6  ;;  %v2812_v15 = vld [vmem:[%s5213_s5 + $0x1a8] sm:$0xff]  ;;  %v3944_v19 = vpack.c.bf16 %v2814_v18, %v2813_v17  ;;  %v2795_v17 = vld [vmem:[%s5211_s3 + $0x1b0] sm:$0xff]  ;;  %v2796_v18 = vld [vmem:[%s5211_s3 + $0x1b8] sm:$0xff] }
 0x7d2   : > { %3829 = vmatprep.subr.bf16.mxu1 %v4110_v3  ;;  %v3941_v16 = vpack.c.bf16 %v2812_v15, %v2811_v14  ;;  %v2793_v14 = vld [vmem:[%s5211_s3 + $0x1a0] sm:$0xff]  ;;  %v2794_v15 = vld [vmem:[%s5211_s3 + $0x1a8] sm:$0xff] }
 0x7d5   : > { %3831 = vmatpush3.bf16.msra.mxu1 %v3830_v20  ;;  %v2815_v20 = vld [vmem:[%s5213_s5 + $0x1c0] sm:$0xff] }
 0x7d6   : > { %3832 = vmatprep.subr.bf16.mxu1 %v4110_v3  ;;  %v3947_v23 = vpack.c.bf16 %v2816_v21, %v2815_v20  ;;  %v2797_v20 = vld [vmem:[%s5211_s3 + $0x1c0] sm:$0xff]  ;;  %v2798_v21 = vld [vmem:[%s5211_s3 + $0x1c8] sm:$0xff] }
 0x7d8   : > { %3398 = vmatmul.mubr.msk.f32.vlgmr.msra.gmra.mrb[16].mxu1 %vm756_vm1, %v4738_v47  ;;  %v2764_v47 = vld [vmem:[%s5215_s7 + $0x108] sm:$0xff] }
 0x7d9   : > { %3834 = vmatpush3.bf16.msra.mxu1 %v3833_v24  ;;  %3432 = vmatprep.mubr.msk.f32.mxu1 %vm4111_vm0, %v4112_v6  ;;  %v3881_v48 = vpack.c.bf16 %v2764_v47, %v2763_v46  ;;  %v2817_v24 = vld [vmem:[%s5213_s5 + $0x1d0] sm:$0xff]  ;;  %v2824_v47 = vld [vmem:[%s5214_s6 + $0x3] ss:$0 sm:$0xff] }
 0x7da   : > { %3835 = vmatprep.subr.bf16.mxu1 %v4110_v3  ;;  %v3950_v26 = vpack.c.bf16 %v2818_v25, %v2817_v24  ;;  %v2799_v24 = vld [vmem:[%s5211_s3 + $0x1d0] sm:$0xff]  ;;  %v2800_v25 = vld [vmem:[%s5211_s3 + $0x1d8] sm:$0xff] }
 0x7dd   : > { %3837 = vmatpush3.bf16.msra.mxu1 %v3836_v27  ;;  %v2819_v27 = vld [vmem:[%s5213_s5 + $0x1e0] sm:$0xff] }
 0x7de   : > { %3838 = vmatprep.subr.bf16.mxu1 %v4110_v3  ;;  %v3953_v29 = vpack.c.bf16 %v2820_v28, %v2819_v27  ;;  %v2801_v27 = vld [vmem:[%s5211_s3 + $0x1e0] sm:$0xff]  ;;  %v2802_v28 = vld [vmem:[%s5211_s3 + $0x1e8] sm:$0xff] }
 0x7e1   : > { %3840 = vmatpush3.bf16.msra.mxu1 %v3839_v30  ;;  %v2821_v30 = vld [vmem:[%s5213_s5 + $0x1f0] sm:$0xff] }
 0x7e2   : > { %3841 = vmatprep.subr.bf16.mxu1 %v4110_v3  ;;  %v3956_v32 = vpack.c.bf16 %v2822_v31, %v2821_v30  ;;  %v2803_v30 = vld [vmem:[%s5211_s3 + $0x1f0] sm:$0xff]  ;;  %v2804_v31 = vld [vmem:[%s5211_s3 + $0x1f8] sm:$0xff] }
 0x7e5   : > { %3843 = vmatpush3.bf16.msra.mxu1 %v3842_v33 }
 0x7e6   : > { %3844 = vmatprep.subr.bf16.mxu1 %v4110_v3 }
 0x7e9   : > { %3846 = vmatpush3.bf16.msra.mxu1 %v3845_v36 }
 0x7ea   : > { %3847 = vmatprep.subr.bf16.mxu1 %v4110_v3 }
 0x7ed   : > { %3849 = vmatpush3.bf16.msra.mxu1 %v3848_v39 }
 0x7ee   : > { %3850 = vmatprep.subr.bf16.mxu1 %v4110_v3 }
 0x7f1   : > { %3852 = vmatpush3.bf16.msra.mxu1 %v3851_v42 }
 0x7f2   : > { %3853 = vmatprep.subr.bf16.mxu1 %v4110_v3 }
 0x7f5   : > { %3855 = vmatpush3.bf16.msra.mxu1 %v3854_v45 }
 0x7f6   : > { %3880 = vmatprep.subr.bf16.mxu1 %v4110_v3 }
 0x7f8   : > { %3433 = vmatmul.mubr.f32.vlgmr.msra.gmra.mrb[18].mxu1 %v4421_v22 }
 0x7f9   : > { %3882 = vmatpush3.bf16.msra.mxu1 %v3881_v48  ;;  %3502 = vmatprep.mubr.msk.f32.mxu1 %vm4111_vm0, %v4112_v6 }
 0x7fa   : > { %3883 = vmatprep.subr.bf16.mxu1 %v4110_v3 }
 0x7fd   : > { %3885 = vmatpush3.bf16.msra.mxu1 %v3884_v51 }
 0x7fe   : > { %3886 = vmatprep.subr.bf16.mxu1 %v4110_v3 }
 0x801   : > { %3888 = vmatpush3.bf16.msra.mxu1 %v3887_v54 }
 0x802   : > { %3889 = vmatprep.subr.bf16.mxu1 %v4110_v3 }
 0x805   : > { %3891 = vmatpush3.bf16.msra.mxu1 %v3890_v57 }
 0x806   : > { %3892 = vmatprep.subr.bf16.mxu1 %v4110_v3 }
 0x809   : > { %3894 = vmatpush3.bf16.msra.mxu1 %v3893_v60  ;;  %v2784_v60 = vld [vmem:[%s5217_s9 + $0x40] sm:$0xff] }
 0x80a   : > { %3895 = vmatprep.subr.bf16.mxu1 %v4110_v3 }
 0x80d   : > { %3897 = vmatpush3.bf16.msra.mxu1 %v3896_v63  ;;  %v3905_v63 = vpack.c.bf16 %v2785_v61, %v2784_v60  ;;  %v2806_v61 = vld [vmem:[%s5212_s4 + $0x3] ss:$0 sm:$0xff] }
 0x80e   : > { %3898 = vmatprep.subr.bf16.mxu1 %v4110_v3 }
 0x811   : > { %3900 = vmatpush3.bf16.msra.mxu1 %v3899_v2  ;;  %v2787_v2 = vld [vmem:[%s5217_s9 + $0x58] sm:$0xff] }
 0x812   : > { %3901 = vmatprep.subr.bf16.mxu1 %v4110_v3  ;;  %v3908_v4 = vpack.c.bf16 %v2787_v2, %v2786_v1 }
 0x815   : > { %3903 = vmatpush3.bf16.msra.mxu1 %v3902_v7  ;;  %v2790_v7 = vld [vmem:[%s5211_s3 + $0x188] sm:$0xff] }
 0x816   : > { %3934 = vmatprep.subr.bf16.mxu1 %v4110_v3  ;;  %v3911_v8 = vpack.c.bf16 %v2790_v7, %v2789_v5 }
 0x818   : > { %3503 = vmatmul.mubr.f32.vlgmr.msra.gmra.mrb[20].mxu1 %v4421_v22 }
 0x819   : > { %3936 = vmatpush3.bf16.msra.mxu1 %v3935_v10  ;;  %3593 = vmatprep.mubr.msk.f32.mxu1 %vm4111_vm0, %v4112_v6  ;;  %v2792_v10 = vld [vmem:[%s5211_s3 + $0x198] sm:$0xff] }
 0x81a   : > { %3937 = vmatprep.subr.bf16.mxu1 %v4110_v3 }
 0x81d   : > { %3939 = vmatpush3.bf16.msra.mxu1 %v3938_v13  ;;  %v3914_v13 = vpack.c.bf16 %v2792_v10, %v2791_v9 }
 0x81e   : > { %3940 = vmatprep.subr.bf16.mxu1 %v4110_v3 }
 0x821   : > { %3942 = vmatpush3.bf16.msra.mxu1 %v3941_v16  ;;  %v3917_v16 = vpack.c.bf16 %v2794_v15, %v2793_v14  ;;  %v2846_v15 = vld [vmem:[%s5217_s9 + $0x60] sm:$0xff] }
 0x822   : > { %3943 = vmatprep.subr.bf16.mxu1 %v4110_v3 }
 0x825   : > { %3945 = vmatpush3.bf16.msra.mxu1 %v3944_v19  ;;  %v3920_v19 = vpack.c.bf16 %v2796_v18, %v2795_v17 }
 0x826   : > { %3946 = vmatprep.subr.bf16.mxu1 %v4110_v3 }
 0x829   : > { %3948 = vmatpush3.bf16.msra.mxu1 %v3947_v23  ;;  %v3923_v23 = vpack.c.bf16 %v2798_v21, %v2797_v20  ;;  %v2848_v20 = vld [vmem:[%s5217_s9 + $0x70] sm:$0xff]  ;;  %v2849_v21 = vld [vmem:[%s5217_s9 + $0x78] sm:$0xff] }
 0x82a   : > { %3949 = vmatprep.subr.bf16.mxu1 %v4110_v3 }
 0x82d   : > { %3951 = vmatpush3.bf16.msra.mxu1 %v3950_v26  ;;  %v3926_v26 = vpack.c.bf16 %v2800_v25, %v2799_v24 }
 0x82e   : > { %3952 = vmatprep.subr.bf16.mxu1 %v4110_v3 }
 0x831   : > { %3954 = vmatpush3.bf16.msra.mxu1 %v3953_v29  ;;  %v3929_v29 = vpack.c.bf16 %v2802_v28, %v2801_v27  ;;  %v2851_v27 = vld [vmem:[%s5218_s10] ss:$0 sm:$0xff] }
 0x832   : > { %3955 = vmatprep.subr.bf16.mxu1 %v4110_v3 }
 0x835   : > { %3957 = vmatpush3.bf16.msra.mxu1 %v3956_v32  ;;  %v3932_v32 = vpack.c.bf16 %v2804_v31, %v2803_v30 }
 0x836   : > { %3631 = vmatprep.subr.mxu1 %v4112_v6 }
 0x838   : > { %3594 = vmatmul.mubr.f32.vlgmr.msra.gmra.mrb[22].mxu1 %v4421_v22 }
 0x839   : > { %3633 = vmatprep.mubr.msk.f32.mxu1 %vm4111_vm0, %v4112_v6 }
 0x8a3   : > { %v1442_v33 = vpop.f32.mrb[14].mxu1 }
 0x8a4   : > { %v3388_v34 = vpop.f32.mrb[15].mxu1 }
 0x8a5   : > { %v2826_v34 = vld [vmem:[%s5215_s7 + $0x188] sm:$0xff] }
 0x8ab   : > { %v1515_v35 = vpop.f32.mrb[16].mxu1 }
 0x8ac   : > { %v4974_v36 = vadd.f32 %v1515_v35, %v1442_v33  ;;  %v3399_v37 = vpop.f32.mrb[17].mxu1  ;;  %v2825_v33 = vld [vmem:[%s5215_s7 + $0x180] sm:$0xff] }
 0x8ad   : > { %v3959_v35 = vpack.c.bf16 %v2826_v34, %v2825_v33  ;;  %v2827_v37 = vld [vmem:[%s5215_s7 + $0x190] sm:$0xff] }
 0x8cb   : > { %v1610_v39 = vpop.f32.mrb[18].mxu1 }
 0x8cc   : > { %v1611_v40 = vadd.f32 %v2744_v38, %v1610_v39  ;;  %v3434_v41 = vpop.f32.mrb[19].mxu1  ;;  %v2828_v38 = vld [vmem:[%s5215_s7 + $0x198] sm:$0xff] }
 0x8cd   : > { %v3962_v39 = vpack.c.bf16 %v2828_v38, %v2827_v37  ;;  %v2830_v41 = vld [vmem:[%s5215_s7 + $0x1a8] sm:$0xff] }
 0x8ce   : > { %v1614_v42 = vmul.f32 0.17677669, %v1611_v40  ;;  %v2829_v40 = vld [vmem:[%s5215_s7 + $0x1a0] sm:$0xff] }
 0x8d0   : > { %3508 = vmatmul.mubr.msk.f32.vlgmr.msra.gmra.mrb[10].mxu0 %vm756_vm1, %v1614_v42  ;;  %v3965_v42 = vpack.c.bf16 %v2830_v41, %v2829_v40 }
 0x8d1   : > { %3512 = vmatprep.mubr.msk.f32.mxu0 %vm4111_vm0, %v4112_v6 }
 0x8eb   : > { %v1801_v44 = vpop.f32.mrb[20].mxu1 }
 0x8ec   : > { %v1802_v45 = vadd.f32 %v2780_v43, %v1801_v44  ;;  %v3504_v46 = vpop.f32.mrb[21].mxu1  ;;  %v2831_v43 = vld [vmem:[%s5215_s7 + $0x1b0] sm:$0xff]  ;;  %v2832_v44 = vld [vmem:[%s5215_s7 + $0x1b8] sm:$0xff] }
 0x8ed   : > { %v2833_v46 = vld [vmem:[%s5215_s7 + $0x1c0] sm:$0xff] }
 0x8ee   : > { %3511 = vmatpush3.msra.mxu0 %v1802_v45  ;;  %v3968_v45 = vpack.c.bf16 %v2832_v44, %v2831_v43 }
 0x8ef   : > { %3904 = vmatprep.subr.bf16.mxu0 %v4110_v3 }
 0x90b   : > { %v2231_v48 = vpop.f32.mrb[22].mxu1 }
 0x90c   : > { %v2232_v49 = vadd.f32 %v2824_v47, %v2231_v48  ;;  %v3595_v50 = vpop.f32.mrb[23].mxu1  ;;  %v2834_v47 = vld [vmem:[%s5215_s7 + $0x1c8] sm:$0xff] }
 0x90d   : > { %v3971_v48 = vpack.c.bf16 %v2834_v47, %v2833_v46  ;;  %v2836_v50 = vld [vmem:[%s5215_s7 + $0x1d8] sm:$0xff] }
 0x90e   : > { %3632 = vmatpush3.xpose.msk.msra.mxu1 %vm756_vm1, %v2232_v49  ;;  %v2835_v49 = vld [vmem:[%s5215_s7 + $0x1d0] sm:$0xff] }
 0x90f   : > { %3636 = vmatprep.subr.mxu1 %v4112_v6 }
 0x9a3   : > { %v1877_v51 = vpop.f32.mrb[10].mxu0 }
 0x9a4   : > { %v3509_v52 = vpop.f32.mrb[11].mxu0  ;;  %v1881_v53 = vsel %vm833_vm2, %v1877_v51, -inf }
 0x9a5   : > { %1882 = vmax.xlane.f32.xlu0 %v1881_v53  ;;  %v2837_v52 = vld [vmem:[%s5215_s7 + $0x1e0] sm:$0xff]  ;;  %v2838_v53 = vld [vmem:[%s5215_s7 + $0x1e8] sm:$0xff] }
 0xa32   : > { %v1883_v54 = vpop.xlane.xlu0 %1882 }
 0xa33   : > { %v1884_v55 = vsub.f32 %v1877_v51, %v1883_v54  ;;  %v3974_v51 = vpack.c.bf16 %v2836_v50, %v2835_v49  ;;  %v3977_v54 = vpack.c.bf16 %v2838_v53, %v2837_v52 }
 0xa35   : > { %v1885_v56 = vmul.f32 1.442695, %v1884_v55  ;;  %v2839_v55 = vld [vmem:[%s5215_s7 + $0x1f0] sm:$0xff] }
 0xa37   : > { %4038 = vpow2.f32 %v1885_v56  ;;  %v2840_v56 = vld [vmem:[%s5215_s7 + $0x1f8] sm:$0xff] }
 0xa41   : > { %v4039_v57 = vpop.eup %4038 }
 0xa42   : > { %v1887_v58 = vsel %vm833_vm2, %v4039_v57, 0.0 }
 0xa43   : > { %1888 = vadd.xlane.f32.xlu1 %v1887_v58 }
 0xad0   : > { %v1889_v59 = vpop.xlane.xlu1 %1888 }
 0xad1   : > { %4040 = vrcp.f32 %v1889_v59 }
 0xadb   : > { %v4041_v62 = vpop.eup %4040 }
 0xadc   : > { %v1891_v0 = vmul.f32 %v4041_v62, %v4039_v57  ;;  %v3980_v57 = vpack.c.bf16 %v2840_v56, %v2839_v55 }
 0xade   : > { %3513 = vmatmul.mubr.msk.f32.vlgmr.msra.gmra.mrb[12].mxu0 %vm833_vm2, %v1891_v0 }
 0xadf   : > { %3906 = vmatpush3.bf16.msra.mxu0 %v3905_v63  ;;  %3523 = vmatprep.mubr.msk.f32.mxu0 %vm4111_vm0, %v4112_v6 }
 0xae0   : > { %3907 = vmatprep.subr.bf16.mxu0 %v4110_v3 }
 0xae3   : > { %3909 = vmatpush3.bf16.msra.mxu0 %v3908_v4 }
 0xae4   : > { %3910 = vmatprep.subr.bf16.mxu0 %v4110_v3 }
 0xbb1   : > { %v1961_v11 = vpop.f32.mrb[12].mxu0 }
 0xbb2   : > { %v3514_v12 = vpop.f32.mrb[13].mxu0  ;;  %3524 = vmatmul.mubr.msk.f32.vlgmr.msra.gmra.mrb[14].mxu0 %vm756_vm1, %v1961_v11 }
 0xbb3   : > { %3912 = vmatpush3.bf16.msra.mxu0 %v3911_v8  ;;  %3558 = vmatprep.mubr.msk.f32.mxu0 %vm4111_vm0, %v4112_v6 }
 0xbb4   : > { %3913 = vmatprep.subr.bf16.mxu0 %v4110_v3 }
 0xbb7   : > { %3915 = vmatpush3.bf16.msra.mxu0 %v3914_v13 }
 0xbb8   : > { %3916 = vmatprep.subr.bf16.mxu0 %v4110_v3 }
 0xbbb   : > { %3918 = vmatpush3.bf16.msra.mxu0 %v3917_v16  ;;  %v2847_v16 = vld [vmem:[%s5217_s9 + $0x68] sm:$0xff] }
 0xbbc   : > { %3919 = vmatprep.subr.bf16.mxu0 %v4110_v3  ;;  %v3983_v18 = vpack.c.bf16 %v2847_v16, %v2846_v15 }
 0xbbf   : > { %3921 = vmatpush3.bf16.msra.mxu0 %v3920_v19 }
 0xbc0   : > { %3922 = vmatprep.subr.bf16.mxu0 %v4110_v3 }
 0xbc3   : > { %3924 = vmatpush3.bf16.msra.mxu0 %v3923_v23  ;;  %v3986_v23 = vpack.c.bf16 %v2849_v21, %v2848_v20 }
 0xbc4   : > { %3925 = vmatprep.subr.bf16.mxu0 %v4110_v3 }
 0xbc7   : > { %3927 = vmatpush3.bf16.msra.mxu0 %v3926_v26 }
 0xbc8   : > { %3928 = vmatprep.subr.bf16.mxu0 %v4110_v3 }
 0xbcb   : > { %3930 = vmatpush3.bf16.msra.mxu0 %v3929_v29 }
 0xbcc   : > { %3931 = vmatprep.subr.bf16.mxu0 %v4110_v3 }
 0xbcf   : > { %3933 = vmatpush3.bf16.msra.mxu0 %v3932_v32 }
 0xbd0   : > { %3958 = vmatprep.subr.bf16.mxu0 %v4110_v3 }
 0xbd2   : > { %3559 = vmatmul.mubr.f32.vlgmr.msra.gmra.mrb[16].mxu0 %v4421_v22 }
 0xbd3   : > { %3960 = vmatpush3.bf16.msra.mxu0 %v3959_v35  ;;  %3628 = vmatprep.mubr.msk.f32.mxu0 %vm4111_vm0, %v4112_v6 }
 0xbd4   : > { %3961 = vmatprep.subr.bf16.mxu0 %v4110_v3 }
 0xbd7   : > { %3963 = vmatpush3.bf16.msra.mxu0 %v3962_v39 }
 0xbd8   : > { %3964 = vmatprep.subr.bf16.mxu0 %v4110_v3 }
 0xbdb   : > { %3966 = vmatpush3.bf16.msra.mxu0 %v3965_v42 }
 0xbdc   : > { %3967 = vmatprep.subr.bf16.mxu0 %v4110_v3 }
 0xbdf   : > { %3969 = vmatpush3.bf16.msra.mxu0 %v3968_v45 }
 0xbe0   : > { %3970 = vmatprep.subr.bf16.mxu0 %v4110_v3 }
 0xbe3   : > { %3972 = vmatpush3.bf16.msra.mxu0 %v3971_v48 }
 0xbe4   : > { %3973 = vmatprep.subr.bf16.mxu0 %v4110_v3 }
 0xbe7   : > { %3975 = vmatpush3.bf16.msra.mxu0 %v3974_v51 }
 0xbe8   : > { %3976 = vmatprep.subr.bf16.mxu0 %v4110_v3 }
 0xbeb   : > { %3978 = vmatpush3.bf16.msra.mxu0 %v3977_v54 }
 0xbec   : > { %3979 = vmatprep.subr.bf16.mxu0 %v4110_v3 }
 0xbef   : > { %3981 = vmatpush3.bf16.msra.mxu0 %v3980_v57 }
 0xbf2   : > { %3629 = vmatmul.mubr.f32.vlgmr.msra.gmra.mrb[18].mxu0 %v4421_v22  ;;  %v2842_v22 = vld [vmem:[%s5216_s8 + $0x3] ss:$0 sm:$0xff] }
 0xc85   : > { %v2039_v58 = vpop.f32.mrb[14].mxu0 }
 0xc86   : > { %v2043_v59 = vadd.f32 %v2039_v58, %v4974_v36  ;;  %v3525_v60 = vpop.f32.mrb[15].mxu0 }
 0xca5   : > { %v2135_v62 = vpop.f32.mrb[16].mxu0 }
 0xca6   : > { %v2136_v63 = vadd.f32 %v2806_v61, %v2135_v62  ;;  %v3560_v0 = vpop.f32.mrb[17].mxu0 }
 0xca8   : > { %v2139_v1 = vmul.f32 0.17677669, %v2136_v63 }
 0xcaa   : > { %3634 = vmatmul.mubr.msk.f32.vlgmr.msra.gmra.mrb[24].mxu1 %vm756_vm1, %v2139_v1 }
 0xcab   : > { %3638 = vmatprep.mubr.msk.f32.mxu1 %vm4111_vm0, %v4112_v6 }
 0xcc5   : > { %v2326_v2 = vpop.f32.mrb[18].mxu0 }
 0xcc6   : > { %v2327_v36 = vadd.f32 %v2842_v22, %v2326_v2  ;;  %v3630_v4 = vpop.f32.mrb[19].mxu0 }
 0xcc8   : > { %3637 = vmatpush3.msra.mxu1 %v2327_v36 }
 0xcc9   : > { %3982 = vmatprep.subr.bf16.mxu1 %v4110_v3 }
 0xd7d   : > { %v2402_v5 = vpop.f32.mrb[24].mxu1 }
 0xd7e   : > { %v3635_v7 = vpop.f32.mrb[25].mxu1  ;;  %v2406_v8 = vsel %vm833_vm2, %v2402_v5, -inf }
 0xd7f   : > { %2407 = vmax.xlane.f32.xlu0 %v2406_v8 }
 0xe0c   : > { %v2408_v9 = vpop.xlane.xlu0 %2407 }
 0xe0d   : > { %v2409_v10 = vsub.f32 %v2402_v5, %v2408_v9 }
 0xe0f   : > { %v2410_v11 = vmul.f32 1.442695, %v2409_v10 }
 0xe11   : > { %4042 = vpow2.f32 %v2410_v11 }
 0xe1b   : > { %v4043_v12 = vpop.eup %4042 }
 0xe1c   : > { %v2412_v13 = vsel %vm833_vm2, %v4043_v12, 0.0 }
 0xe1d   : > { %2413 = vadd.xlane.f32.xlu1 %v2412_v13 }
 0xeaa   : > { %v2414_v14 = vpop.xlane.xlu1 %2413 }
 0xeab   : > { %4044 = vrcp.f32 %v2414_v14 }
 0xeb5   : > { %v4045_v17 = vpop.eup %4044 }
 0xeb6   : > { %v2416_v19 = vmul.f32 %v4045_v17, %v4043_v12 }
 0xeb8   : > { %3639 = vmatmul.mubr.msk.f32.vlgmr.msra.gmra.mrb[26].mxu1 %vm833_vm2, %v2416_v19 }
 0xeb9   : > { %3984 = vmatpush3.bf16.msra.mxu1 %v3983_v18  ;;  %3649 = vmatprep.mubr.msk.f32.mxu1 %vm4111_vm0, %v4112_v6 }
 0xeba   : > { %3985 = vmatprep.subr.bf16.mxu1 %v4110_v3 }
 0xebd   : > { %3987 = vmatpush3.bf16.msra.mxu1 %v3986_v23 }
 0xf8b   : > { %v2486_v24 = vpop.f32.mrb[26].mxu1 }
 0xf8c   : > { %v3640_v25 = vpop.f32.mrb[27].mxu1  ;;  %3650 = vmatmul.mubr.msk.f32.vlgmr.msra.gmra.mrb[28].mxu1 %vm756_vm1, %v2486_v24 }
0x105f   : > { %v2564_v26 = vpop.f32.mrb[28].mxu1 }
0x1060   : > { %v2568_v28 = vadd.f32 %v2564_v26, %v2043_v59  ;;  %v3651_v6 = vpop.f32.mrb[29].mxu1 }
0x1062   : > { %v2576_v29 = vadd.f32 %v2851_v27, %v2568_v28 }
0x1064   : > { %2577 = vst [vmem:[%s377_s13] sm:$0xff] %v2576_v29 }
0x1065   : > { %4059 = shalt.err (!%p4056_p3)
}
0x1066   : > { %s4060_s30 = scalar_lea.hbm %s5166_s24, 128  ;;  %s4064_s13 = scalar_lea.hbm %s5219_s11, 256 }
0x1067   : > { %p4061_p4 = scmp.ne.s32.totalorder %s5166_s24, %s4060_s30  ;;  %p4065_p9 = scmp.lt.u32.totalorder %s5166_s24, %s5219_s11 }
0x1068   : > { %p4066_p10 = scmp.lt.u32.totalorder %s4064_s13, %s4060_s30  ;;  %p4068_p12 = scmp.lt.u32.totalorder %s4060_s30, %s5166_s24 }
0x1069   : > { %p4062_p7 = pnand %p4061_p4, %p4212_p5 }
0x106a   : > { %p4067_p11 = por %p4066_p10, %p4065_p9 }
0x106b   : > { %p4063_p8 = pneg %p4062_p7 }
0x106c   : > { %p4069_p13 = por %p4068_p12, %p4067_p11 }
0x106e   : > { %p4070_p0 = pnand %p4069_p13, %p4063_p8 }
0x1070   : > { %4073 = shalt.err (!%p4070_p0)
}
0x1071   : > { %3988 = dma.vmem_to_hbm [thread:$0]  (%p4212_p5), %s5168_s14, 128, %s5166_s24, %s2579_s25  }
0x1072 PF: > { %p3994_p1 = scmp.ge.s32.totalorder %s4108_s20, 2  ;;  %s2604_s29 = sand.u32 1, %s4096_s17  }
0x1073   : > { %s2605_s21 = scalar_lea.sflag [#allocation3], %s2604_s29 }
0x1074   : > { %p3991_p2 = pnand %p3994_p1, %p4216_p6 }
0x1076   : > { %4091 = dma.done.wait (!%p3991_p2), %s2605_s21, 128  }
0x1077   : > { %4093 = vsyncadd (!%p3991_p2), %s2605_s21, 4294967168  ;;  %s5225_s12 = sld [smem:[#allocation5_spill]]  ;;  %p21_p3 = scmp.ge.s32.totalorder %s4199_s23, 4  }
0x1078   : > { %s5226_s17 = smov %s4100_s18  ;;  %s5227_s18 = smov %s4104_s19 }
0x1079   : > { %s5229_s20 = smov %s4199_s23  ;;  %23 = sbr.rel (!%p21_p3) target bundleno = 5 (0x5), region = 120 }
0x107d   : > { %s5228_s19 = smov %s5225_s12 }
0x1080   :  { %2610 = vsyncpa [#allocation3], 1 }
0x1081   :  { %2612 = vsyncpa [#allocation3 + $0x1], 1 }

</bundles_post_ra>
